<compile_context>
chip_gen: v7x
topology: tpu7x:2x2x1
jax: 0.10.0
libtpu: 0.0.40
codegen_flags: <defaults>
</compile_context>

<pallas_src>
import math
import functools

import jax
import jax.numpy as jnp
import numpy as np
from jax.experimental import pallas as pl
from jax.experimental.pallas import tpu as pltpu


# --------------------------- VMEM budget (per generation) --------------------

@functools.lru_cache(None)
def _vmem_limit_bytes():
    """~75% of physical per-core VMEM (48 MiB on v7x, 96 MiB on v5e/v6e)."""
    try:
        info = pltpu.get_tpu_info()
        cap = int(getattr(info, "vmem_capacity_bytes", 128 * 1024 * 1024))
    except Exception:
        cap = 64 * 1024 * 1024          # unknown chip: stay conservative
    return max(32 * 1024 * 1024, (cap * 3) // 4)


# ------------------------------ helpers -------------------------------------

def _rmsnorm(x, w, eps):
    var = jnp.mean(x * x, axis=-1, keepdims=True)
    return x * jax.lax.rsqrt(var + eps) * w


def _expand_heads(t, num_heads):
    """(T, d) -> (T, num_heads*d): broadcast a per-head RoPE table across heads."""
    T, d = t.shape
    return jnp.broadcast_to(t[:, None, :], (T, num_heads, d)).reshape(T, num_heads * d)


def _rope(x, cos, sin_even, sin_odd):
    """Interleaved rotate-half RoPE on a (T, W) tile.

    Parity and sign are pre-folded into the two mutually-masked sin tables, so
    the swizzle is just two lane rolls (XLU slot) + fused multiply-adds — no
    iota / compare / where.  Pair partners never straddle lane 0 / W-1 because
    the masked tables zero the wrap-around contributions.
    """
    W = x.shape[-1]
    nxt = pltpu.roll(x, W - 1, 1)     # x[:, (l+1) % W]
    prv = pltpu.roll(x, 1, 1)         # x[:, (l-1) % W]
    return x * cos + nxt * sin_even + prv * sin_odd


def _spec(block_shape, index_map, *, single_buffer=False):
    """BlockSpec; constant / slowly-varying operands get a single VMEM buffer."""
    if single_buffer:
        return pl.BlockSpec(block_shape, index_map, pipeline_mode=pl.Buffered(1))
    return pl.BlockSpec(block_shape, index_map)


def _default_tile(S, target=256):
    """Largest divisor of S that is <= target (256 fills the v6e/v7x MXU;
    128-multiples are enough on v5e)."""
    t = min(S, target)
    while S % t:
        t -= 1
    return t


# --------------------------- kernel A: K/V + RoPE(K) -------------------------

def kv_rope_kernel(x_ref, cos_ref, sine_ref, sino_ref, wkv_ref, k_ref, v_ref,
                   *, num_heads, head_dim):
    H = num_heads * head_dim

    xb = x_ref[0].astype(jnp.bfloat16)                                   # (TS, H)
    kv = jnp.dot(xb, wkv_ref[...], preferred_element_type=jnp.float32)   # (TS, 2H) f32

    cos = _expand_heads(cos_ref[...], num_heads)                          # (TS, H)
    sin_e = _expand_heads(sine_ref[...], num_heads)
    sin_o = _expand_heads(sino_ref[...], num_heads)

    k = _rope(kv[:, :H], cos, sin_e, sin_o)

    # lane-dense (TS, H) bf16 stores: no head-major layout, no masked vst
    k_ref[0] = k.astype(k_ref.dtype)
    v_ref[0] = kv[:, H:].astype(v_ref.dtype)


def kv_rope_project(x, cos, sin_e, sin_o, wkv, *, num_heads, head_dim,
                    seq_tile, single_buffer):
    B, S, H = x.shape
    d = head_dim
    n_s = S // seq_tile
    kernel = functools.partial(kv_rope_kernel,
                               num_heads=num_heads, head_dim=head_dim)
    kv_shape = jax.ShapeDtypeStruct((B, S, H), jnp.bfloat16)
    kv_spec = pl.BlockSpec((1, seq_tile, H), lambda b, s: (b, s, 0))
    return pl.pallas_call(
        kernel,
        out_shape=(kv_shape, kv_shape),
        grid_spec=pltpu.PrefetchScalarGridSpec(
            num_scalar_prefetch=0,
            grid=(B, n_s),
            in_specs=[
                pl.BlockSpec((1, seq_tile, H), lambda b, s: (b, s, 0)),    # x
                pl.BlockSpec((seq_tile, d), lambda b, s: (s, 0)),          # cos (per-head)
                pl.BlockSpec((seq_tile, d), lambda b, s: (s, 0)),          # sin even (-sign)
                pl.BlockSpec((seq_tile, d), lambda b, s: (s, 0)),          # sin odd
                _spec((H, 2 * H), lambda b, s: (0, 0),
                      single_buffer=single_buffer),                        # fused Wk|Wv
            ],
            out_specs=(kv_spec, kv_spec)),
        compiler_params=pltpu.CompilerParams(
            dimension_semantics=("parallel", "parallel"),
            vmem_limit_bytes=_vmem_limit_bytes()),
    )(x, cos, sin_e, sin_o, wkv)


# -------------- kernel B: Q proj + RoPE + attention + out proj + FFN ---------

def attn_ffn_kernel(x_ref, k_ref, v_ref, mask_ref, cos_ref, sine_ref, sino_ref,
                    wq_ref, wo_ref, rms1_ref, wgu_ref, wd_ref, wod_ref, rms2_ref,
                    out_ref, *, num_heads, head_dim, inter, eps, approx_recip):
    H = num_heads * head_dim
    TQ = x_ref.shape[1]
    S = k_ref.shape[1]

    x32 = x_ref[0]                                   # (TQ, H) f32 residual
    xb = x32.astype(jnp.bfloat16)

    # --- Q projection + RoPE (Q never round-trips through HBM) ---
    q = jnp.dot(xb, wq_ref[...], preferred_element_type=jnp.float32)      # (TQ, H)
    cos = _expand_heads(cos_ref[...], num_heads)
    sin_e = _expand_heads(sine_ref[...], num_heads)
    sin_o = _expand_heads(sino_ref[...], num_heads)
    q = _rope(q, cos, sin_e, sin_o)

    # --- head split on the VMEM-resident tiles (K/V arrive lane-dense) ---
    q3 = jnp.transpose(q.reshape(TQ, num_heads, head_dim), (1, 0, 2)
                       ).astype(jnp.bfloat16)                              # (nh, TQ, d)
    k3 = jnp.transpose(k_ref[0].reshape(S, num_heads, head_dim), (1, 0, 2))  # (nh, S, d)
    v3 = jnp.transpose(v_ref[0].reshape(S, num_heads, head_dim), (1, 0, 2))

    # --- batched-head scaled dot-product attention, f32 accumulation ---
    # TODO(synk): flash-style inner key loop would cap the (nh, TQ, S) scores
    #             for very long sequences; full-sequence K/V kept here.
    scale = 1.0 / math.sqrt(head_dim)
    s = jnp.einsum('hqd,hkd->hqk', q3, k3,
                   preferred_element_type=jnp.float32)                     # (nh, TQ, S)
    s = s * scale + mask_ref[...]                                          # (1,1,S) bcast
    s = s - jnp.max(s, axis=-1, keepdims=True)
    p = jnp.exp(s)
    denom = jnp.sum(p, axis=-1, keepdims=True)
    if approx_recip:
        p = p * pl.reciprocal(denom, approx=True)                          # EUP slot
    else:
        p = p / denom
    ctx3 = jnp.einsum('hqk,hkd->hqd', p.astype(jnp.bfloat16), v3,
                      preferred_element_type=jnp.float32)                  # (nh, TQ, d)

    # --- DiffBertSelfOutput: per-head fused output projection (no transpose) ---
    attn = jnp.zeros((TQ, H), jnp.float32)
    for h in range(num_heads):
        attn = attn + jnp.dot(
            ctx3[h].astype(jnp.bfloat16),
            wo_ref[h * head_dim:(h + 1) * head_dim, :],
            preferred_element_type=jnp.float32)
    h1 = _rmsnorm(attn + x32, rms1_ref[...], eps)

    # --- DiffBertIntermediate (fused gate/up SwiGLU) + DiffBertOutput ---
    h1b = h1.astype(jnp.bfloat16)
    gu = jnp.dot(h1b, wgu_ref[...], preferred_element_type=jnp.float32)    # (TQ, 2I)
    gate = gu[:, :inter]
    up = gu[:, inter:]
    act = (gate * jax.nn.sigmoid(gate) * up).astype(jnp.bfloat16)          # SiLU * up
    inter_out = jnp.dot(act, wd_ref[...], preferred_element_type=jnp.float32)
    ff = jnp.dot(inter_out.astype(jnp.bfloat16), wod_ref[...],
                 preferred_element_type=jnp.float32)
    h2 = _rmsnorm(ff + h1, rms2_ref[...], eps)

    out_ref[0] = h2.astype(out_ref.dtype)


def attn_ffn(x, k, v, mask, cos, sin_e, sin_o, p, *, num_heads, head_dim, eps,
             q_tile, single_buffer, approx_recip=True):
    B, S, H = x.shape
    d = head_dim
    inter = p["wd"].shape[0]
    n_q = S // q_tile
    sb = single_buffer
    kernel = functools.partial(attn_ffn_kernel, num_heads=num_heads,
                               head_dim=head_dim, inter=inter, eps=eps,
                               approx_recip=approx_recip)
    return pl.pallas_call(
        kernel,
        out_shape=jax.ShapeDtypeStruct((B, S, H), jnp.float32),
        grid_spec=pltpu.PrefetchScalarGridSpec(
            num_scalar_prefetch=0,
            grid=(B, n_q),   # inner axis = q tile, so K/V block index is constant
            in_specs=[
                pl.BlockSpec((1, q_tile, H), lambda b, t: (b, t, 0)),        # x residual
                _spec((1, S, H), lambda b, t: (b, 0, 0), single_buffer=sb),  # K (lane-dense)
                _spec((1, S, H), lambda b, t: (b, 0, 0), single_buffer=sb),  # V (lane-dense)
                pl.BlockSpec((1, 1, S), lambda b, t: (b, 0, 0)),             # key mask
                pl.BlockSpec((q_tile, d), lambda b, t: (t, 0)),              # cos
                pl.BlockSpec((q_tile, d), lambda b, t: (t, 0)),              # sin even
                pl.BlockSpec((q_tile, d), lambda b, t: (t, 0)),              # sin odd
                _spec((H, H), lambda b, t: (0, 0), single_buffer=sb),        # wq
                _spec((H, H), lambda b, t: (0, 0), single_buffer=sb),        # wo
                _spec((1, H), lambda b, t: (0, 0), single_buffer=sb),        # rms1
                _spec((H, 2 * inter), lambda b, t: (0, 0), single_buffer=sb),  # gate|up
                _spec((inter, H), lambda b, t: (0, 0), single_buffer=sb),    # down proj
                _spec((inter, H), lambda b, t: (0, 0), single_buffer=sb),    # output dense
                _spec((1, H), lambda b, t: (0, 0), single_buffer=sb),        # rms2
            ],
            out_specs=pl.BlockSpec((1, q_tile, H), lambda b, t: (b, t, 0))),
        compiler_params=pltpu.CompilerParams(
            dimension_semantics=("parallel", "parallel"),
            vmem_limit_bytes=_vmem_limit_bytes()),
    )(x, k, v, mask, cos, sin_e, sin_o,
      p["wq"], p["wo"], p["rms1"], p["wgu"], p["wd"], p["wod"], p["rms2"])


# ------------------------------ encoder --------------------------------------

def diffbert_encoder(x, mask, layer_params, *, num_heads, head_dim, eps,
                     seq_tile=None, q_tile=None, single_buffer=True,
                     approx_recip=True):
    """Full DiffBertEncoder forward (last_hidden_state only).

    mask: additive key-padding mask of shape (B, 1, S) (0 keep / -1e4 masked).
    """
    B, S, H = x.shape
    seq_tile = _default_tile(S) if seq_tile is None else seq_tile
    q_tile = _default_tile(S) if q_tile is None else q_tile
    assert S % seq_tile == 0 and S % q_tile == 0
    cos, sin_e, sin_o = _build_rope_tables(S, head_dim)
    h = x
    for p in layer_params:
        k, v = kv_rope_project(h, cos, sin_e, sin_o, p["wkv"],
                               num_heads=num_heads, head_dim=head_dim,
                               seq_tile=seq_tile, single_buffer=single_buffer)
        h = attn_ffn(h, k, v, mask, cos, sin_e, sin_o, p,
                     num_heads=num_heads, head_dim=head_dim, eps=eps,
                     q_tile=q_tile, single_buffer=single_buffer,
                     approx_recip=approx_recip)
    return h


# ------------------------ RoPE / sinusoidal tables ---------------------------

def _sinusoidal_table(seq_len, dim):
    """Matches DiffBertSinusoidalPositionalEmbedding._init_weight (dim even)."""
    pos = np.arange(seq_len)[:, None].astype(np.float64)
    j = np.arange(dim).astype(np.float64)
    position_enc = pos / np.power(10000.0, 2.0 * (j // 2) / dim)[None, :]
    sin_half = np.sin(position_enc[:, 0::2])     # (S, dim//2)
    cos_half = np.cos(position_enc[:, 1::2])     # (S, dim//2)
    return sin_half.astype(np.float32), cos_half.astype(np.float32)


def _build_rope_tables(S, head_dim):
    """Per-head (S, head_dim) cos + two parity-masked, sign-folded sin tables."""
    sin_half, cos_half = _sinusoidal_table(S, head_dim)
    sin_pos = np.repeat(sin_half, 2, axis=-1)          # (S, d) interleaved
    cos_pos = np.repeat(cos_half, 2, axis=-1)
    even = (np.arange(head_dim) % 2 == 0)
    sin_even = np.where(even[None, :], -sin_pos, 0.0).astype(np.float32)
    sin_odd = np.where(even[None, :], 0.0, sin_pos).astype(np.float32)
    return (jnp.asarray(cos_pos, jnp.float32),
            jnp.asarray(sin_even, jnp.float32),
            jnp.asarray(sin_odd, jnp.float32))


# ------------------------------ JAX reference --------------------------------

def _ref_rmsnorm(x, w, eps):
    var = jnp.mean(x.astype(jnp.float32) ** 2, axis=-1, keepdims=True)
    return w * (x * jax.lax.rsqrt(var + eps))


def _ref_layer(x, mask, sin_half, cos_half, p, *, num_heads, head_dim, eps):
    B, S, H = x.shape
    wq = p["wq"].astype(jnp.float32)
    wkv = p["wkv"].astype(jnp.float32)
    wo = p["wo"].astype(jnp.float32)
    wgu = p["wgu"].astype(jnp.float32)
    wd = p["wd"].astype(jnp.float32)
    wod = p["wod"].astype(jnp.float32)
    inter = wd.shape[0]

    q = x @ wq
    kv = x @ wkv
    k, v = kv[..., :H], kv[..., H:]

    def split(t):
        return t.reshape(B, S, num_heads, head_dim).transpose(0, 2, 1, 3)

    ql, kl, vl = split(q), split(k), split(v)
    sin_pos = jnp.repeat(sin_half, 2, axis=-1)[None, None]
    cos_pos = jnp.repeat(cos_half, 2, axis=-1)[None, None]

    def rot_half(t):
        t2 = t.reshape(*t.shape[:-1], head_dim // 2, 2)
        return jnp.stack([-t2[..., 1], t2[..., 0]], axis=-1).reshape(t.shape)

    ql = ql * cos_pos + rot_half(ql) * sin_pos
    kl = kl * cos_pos + rot_half(kl) * sin_pos

    scores = jnp.einsum("bhqd,bhkd->bhqk", ql, kl) / math.sqrt(head_dim)
    scores = scores + mask[:, None, None, :]
    probs = jax.nn.softmax(scores, axis=-1)
    ctx = jnp.einsum("bhqk,bhkd->bhqd", probs, vl)
    ctx = ctx.transpose(0, 2, 1, 3).reshape(B, S, H)

    h1 = _ref_rmsnorm(ctx @ wo + x, p["rms1"][0], eps)
    gu = h1 @ wgu
    gate, up = gu[..., :inter], gu[..., inter:]
    inter_out = (jax.nn.silu(gate) * up) @ wd
    ff = inter_out @ wod
    h2 = _ref_rmsnorm(ff + h1, p["rms2"][0], eps)
    return h2


def _ref_encoder(x, mask, layer_params, *, num_heads, head_dim, eps):
    S = x.shape[1]
    sin_half, cos_half = _sinusoidal_table(S, head_dim)
    sin_half = jnp.asarray(sin_half)
    cos_half = jnp.asarray(cos_half)
    h = x
    for p in layer_params:
        h = _ref_layer(h, mask, sin_half, cos_half, p,
                       num_heads=num_heads, head_dim=head_dim, eps=eps)
    return h


# --------------------------------- main --------------------------------------

if __name__ == "__main__":
    # config (intermediate_size == hidden_size: DiffBertOutput.dense requires it)
    B, S = 2, 8
    H = 32
    NUM_HEADS = 4
    HEAD_DIM = H // NUM_HEADS
    INTER = H
    NUM_LAYERS = 2
    EPS = 1e-6

    key = jax.random.PRNGKey(0)

    def init_w(k, shape, scale=0.05):
        return scale * jax.random.normal(k, shape, dtype=jnp.float32)

    layer_params = []
    for li in range(NUM_LAYERS):
        keys = jax.random.split(jax.random.fold_in(key, li), 10)
        wq = init_w(keys[0], (H, H))
        wk = init_w(keys[1], (H, H))
        wv = init_w(keys[2], (H, H))
        wg = init_w(keys[4], (H, INTER))
        wu = init_w(keys[5], (H, INTER))
        layer_params.append({
            "wq":   wq.astype(jnp.bfloat16),
            "wkv":  jnp.concatenate([wk, wv], axis=1).astype(jnp.bfloat16),
            "wo":   init_w(keys[3], (H, H)).astype(jnp.bfloat16),
            "rms1": (1.0 + 0.1 * jax.random.normal(keys[8], (1, H))).astype(jnp.float32),
            "wgu":  jnp.concatenate([wg, wu], axis=1).astype(jnp.bfloat16),
            "wd":   init_w(keys[6], (INTER, H)).astype(jnp.bfloat16),
            "wod":  init_w(keys[7], (INTER, H)).astype(jnp.bfloat16),
            "rms2": (1.0 + 0.1 * jax.random.normal(keys[9], (1, H))).astype(jnp.float32),
        })

    kx, km = jax.random.split(jax.random.fold_in(key, 1000))
    hidden_states = jax.random.normal(kx, (B, S, H), dtype=jnp.float32)

    # additive key-padding mask (0 = keep, -1e4 = masked); mask last key of batch 1
    mask_np = np.zeros((B, S), np.float32)
    mask_np[1, -1] = -1e4
    mask_vec = jnp.asarray(mask_np)                # (B, S) for the reference
    mask_kernel = mask_vec.reshape(B, 1, S)        # (B, 1, S) for the kernels

    def run(single_buffer):
        out = diffbert_encoder(hidden_states, mask_kernel, layer_params,
                               num_heads=NUM_HEADS, head_dim=HEAD_DIM, eps=EPS,
                               single_buffer=single_buffer)
        return jax.block_until_ready(out)

    try:
        out = run(True)
    except Exception:
        # pl.Buffered(1) single-buffering hint unsupported on this JAX/libtpu
        # build: fall back to default double-buffered BlockSpecs.
        out = run(False)

    ref = _ref_encoder(hidden_states, mask_vec, layer_params,
                       num_heads=NUM_HEADS, head_dim=HEAD_DIM, eps=EPS)
    ref = jax.block_until_ready(ref)

    # bf16 matmul inputs + approx reciprocal => looser tolerance than pure f32
    np.testing.assert_allclose(np.asarray(out), np.asarray(ref),
                               rtol=5e-2, atol=5e-2)
    print("KERNEL_OK")
</pallas_src>

<mosaic_0001>
module attributes {stable_mosaic.version = 11 : i64} {
  func.func @kv_rope_kernel(%arg0: i32, %arg1: i32, %arg2: memref<1x8x32xf32, #tpu.memory_space<vmem>>, %arg3: memref<8x8xf32, #tpu.memory_space<vmem>>, %arg4: memref<8x8xf32, #tpu.memory_space<vmem>>, %arg5: memref<8x8xf32, #tpu.memory_space<vmem>>, %arg6: memref<32x64xbf16, #tpu.memory_space<vmem>>, %arg7: memref<1x8x32xbf16, #tpu.memory_space<vmem>>, %arg8: memref<1x8x32xbf16, #tpu.memory_space<vmem>>) attributes {dimension_semantics = [#tpu.dimension_semantics<parallel>, #tpu.dimension_semantics<parallel>], iteration_bounds = array<i64: 2, 1>, scalar_prefetch = 0 : i64, scratch_operands = 0 : i64, tpu.core_type = #tpu.core_type<tc>, window_params = [{transform_indices = @transform_0, window_bounds = array<i64: 1, 8, 32>}, {transform_indices = @transform_1, window_bounds = array<i64: 8, 8>}, {transform_indices = @transform_2, window_bounds = array<i64: 8, 8>}, {transform_indices = @transform_3, window_bounds = array<i64: 8, 8>}, {pipeline_mode = #tpu.pipeline_mode<synchronous>, transform_indices = @transform_4, window_bounds = array<i64: 32, 64>}, {transform_indices = @transform_5, window_bounds = array<i64: 1, 8, 32>}, {transform_indices = @transform_6, window_bounds = array<i64: 1, 8, 32>}]} {
    %c0 = arith.constant 0 : index
    %c0_0 = arith.constant 0 : index
    %c0_1 = arith.constant 0 : index
    %0 = vector.load %arg2[%c0, %c0_0, %c0_1] : memref<1x8x32xf32, #tpu.memory_space<vmem>>, vector<1x8x32xf32>
    %1 = vector.shape_cast %0 : vector<1x8x32xf32> to vector<8x32xf32>
    %2 = arith.truncf %1 : vector<8x32xf32> to vector<8x32xbf16>
    %c0_2 = arith.constant 0 : index
    %c0_3 = arith.constant 0 : index
    %3 = vector.load %arg6[%c0_2, %c0_3] : memref<32x64xbf16, #tpu.memory_space<vmem>>, vector<32x64xbf16>
    %cst = arith.constant dense<0.000000e+00> : vector<8x64xf32>
    %4 = tpu.matmul %2, %3, %cst {dimension_numbers = #tpu.dot_dimension_numbers<[1], [0], [0], [1], [0, 0, 1, 1], [], []>} : vector<8x32xbf16>, vector<32x64xbf16>, vector<8x64xf32> -> vector<8x64xf32>
    %c0_4 = arith.constant 0 : index
    %c0_5 = arith.constant 0 : index
    %5 = vector.load %arg3[%c0_4, %c0_5] : memref<8x8xf32, #tpu.memory_space<vmem>>, vector<8x8xf32>
    %6 = vector.shape_cast %5 : vector<8x8xf32> to vector<8x1x8xf32>
    %7 = vector.shape_cast %6 : vector<8x1x8xf32> to vector<8x1x8xf32>
    %8 = vector.broadcast %7 : vector<8x1x8xf32> to vector<8x4x8xf32>
    %9 = vector.shape_cast %8 : vector<8x4x8xf32> to vector<8x32xf32>
    %c0_6 = arith.constant 0 : index
    %c0_7 = arith.constant 0 : index
    %10 = vector.load %arg4[%c0_6, %c0_7] : memref<8x8xf32, #tpu.memory_space<vmem>>, vector<8x8xf32>
    %11 = vector.shape_cast %10 : vector<8x8xf32> to vector<8x1x8xf32>
    %12 = vector.shape_cast %11 : vector<8x1x8xf32> to vector<8x1x8xf32>
    %13 = vector.broadcast %12 : vector<8x1x8xf32> to vector<8x4x8xf32>
    %14 = vector.shape_cast %13 : vector<8x4x8xf32> to vector<8x32xf32>
    %c0_8 = arith.constant 0 : index
    %c0_9 = arith.constant 0 : index
    %15 = vector.load %arg5[%c0_8, %c0_9] : memref<8x8xf32, #tpu.memory_space<vmem>>, vector<8x8xf32>
    %16 = vector.shape_cast %15 : vector<8x8xf32> to vector<8x1x8xf32>
    %17 = vector.shape_cast %16 : vector<8x1x8xf32> to vector<8x1x8xf32>
    %18 = vector.broadcast %17 : vector<8x1x8xf32> to vector<8x4x8xf32>
    %19 = vector.shape_cast %18 : vector<8x4x8xf32> to vector<8x32xf32>
    %20 = vector.extract_strided_slice %4 {offsets = [0, 0], sizes = [8, 32], strides = [1, 1]} : vector<8x64xf32> to vector<8x32xf32>
    %c31_i32 = arith.constant 31 : i32
    %21 = tpu.dynamic_rotate %20 by %c31_i32 dim 1 : vector<8x32xf32>, i32 -> vector<8x32xf32>
    %c1_i32 = arith.constant 1 : i32
    %22 = tpu.dynamic_rotate %20 by %c1_i32 dim 1 : vector<8x32xf32>, i32 -> vector<8x32xf32>
    %23 = arith.mulf %20, %9 : vector<8x32xf32>
    %24 = arith.mulf %21, %14 : vector<8x32xf32>
    %25 = arith.addf %23, %24 : vector<8x32xf32>
    %26 = arith.mulf %22, %19 : vector<8x32xf32>
    %27 = arith.addf %25, %26 : vector<8x32xf32>
    %28 = arith.truncf %27 : vector<8x32xf32> to vector<8x32xbf16>
    %c0_10 = arith.constant 0 : index
    %c0_11 = arith.constant 0 : index
    %c0_12 = arith.constant 0 : index
    %29 = vector.load %arg7[%c0_10, %c0_11, %c0_12] : memref<1x8x32xbf16, #tpu.memory_space<vmem>>, vector<1x8x32xbf16>
    %30 = vector.shape_cast %29 : vector<1x8x32xbf16> to vector<8x32xbf16>
    %31 = vector.shape_cast %28 : vector<8x32xbf16> to vector<1x8x32xbf16>
    tpu.vector_store %arg7[%c0_10, %c0_11, %c0_12], %31 {strides = array<i32>} : memref<1x8x32xbf16, #tpu.memory_space<vmem>>, vector<1x8x32xbf16>,
    %32 = vector.extract_strided_slice %4 {offsets = [0, 32], sizes = [8, 32], strides = [1, 1]} : vector<8x64xf32> to vector<8x32xf32>
    %33 = arith.truncf %32 : vector<8x32xf32> to vector<8x32xbf16>
    %c0_13 = arith.constant 0 : index
    %c0_14 = arith.constant 0 : index
    %c0_15 = arith.constant 0 : index
    %34 = vector.load %arg8[%c0_13, %c0_14, %c0_15] : memref<1x8x32xbf16, #tpu.memory_space<vmem>>, vector<1x8x32xbf16>
    %35 = vector.shape_cast %34 : vector<1x8x32xbf16> to vector<8x32xbf16>
    %36 = vector.shape_cast %33 : vector<8x32xbf16> to vector<1x8x32xbf16>
    tpu.vector_store %arg8[%c0_13, %c0_14, %c0_15], %36 {strides = array<i32>} : memref<1x8x32xbf16, #tpu.memory_space<vmem>>, vector<1x8x32xbf16>,
    return
  }
  func.func @transform_0(%arg0: i32, %arg1: i32) -> (i32, i32, i32) {
    %c0_i32 = arith.constant 0 : i32
    %c0_i32_0 = arith.constant 0 : i32
    return %arg0, %arg1, %c0_i32 : i32, i32, i32
  }
  func.func @transform_1(%arg0: i32, %arg1: i32) -> (i32, i32) {
    %c0_i32 = arith.constant 0 : i32
    %c0_i32_0 = arith.constant 0 : i32
    return %arg1, %c0_i32 : i32, i32
  }
  func.func @transform_2(%arg0: i32, %arg1: i32) -> (i32, i32) {
    %c0_i32 = arith.constant 0 : i32
    %c0_i32_0 = arith.constant 0 : i32
    return %arg1, %c0_i32 : i32, i32
  }
  func.func @transform_3(%arg0: i32, %arg1: i32) -> (i32, i32) {
    %c0_i32 = arith.constant 0 : i32
    %c0_i32_0 = arith.constant 0 : i32
    return %arg1, %c0_i32 : i32, i32
  }
  func.func @transform_4(%arg0: i32, %arg1: i32) -> (i32, i32) {
    %c0_i32 = arith.constant 0 : i32
    %c0_i32_0 = arith.constant 0 : i32
    %c0_i32_1 = arith.constant 0 : i32
    return %c0_i32, %c0_i32_0 : i32, i32
  }
  func.func @transform_5(%arg0: i32, %arg1: i32) -> (i32, i32, i32) {
    %c0_i32 = arith.constant 0 : i32
    %c0_i32_0 = arith.constant 0 : i32
    return %arg0, %arg1, %c0_i32 : i32, i32, i32
  }
  func.func @transform_6(%arg0: i32, %arg1: i32) -> (i32, i32, i32) {
    %c0_i32 = arith.constant 0 : i32
    %c0_i32_0 = arith.constant 0 : i32
    return %arg0, %arg1, %c0_i32 : i32, i32, i32
  }
}

module attributes {stable_mosaic.version = 11 : i64} {
  func.func @kv_rope_kernel(%arg0: i32, %arg1: i32, %arg2: memref<1x8x32xf32, #tpu.memory_space<vmem>>, %arg3: memref<8x8xf32, #tpu.memory_space<vmem>>, %arg4: memref<8x8xf32, #tpu.memory_space<vmem>>, %arg5: memref<8x8xf32, #tpu.memory_space<vmem>>, %arg6: memref<32x64xbf16, #tpu.memory_space<vmem>>, %arg7: memref<1x8x32xbf16, #tpu.memory_space<vmem>>, %arg8: memref<1x8x32xbf16, #tpu.memory_space<vmem>>) attributes {dimension_semantics = [#tpu.dimension_semantics<parallel>, #tpu.dimension_semantics<parallel>], iteration_bounds = array<i64: 2, 1>, scalar_prefetch = 0 : i64, scratch_operands = 0 : i64, tpu.core_type = #tpu.core_type<tc>, window_params = [{transform_indices = @transform_0, window_bounds = array<i64: 1, 8, 32>}, {transform_indices = @transform_1, window_bounds = array<i64: 8, 8>}, {transform_indices = @transform_2, window_bounds = array<i64: 8, 8>}, {transform_indices = @transform_3, window_bounds = array<i64: 8, 8>}, {pipeline_mode = #tpu.pipeline_mode<synchronous>, transform_indices = @transform_4, window_bounds = array<i64: 32, 64>}, {transform_indices = @transform_5, window_bounds = array<i64: 1, 8, 32>}, {transform_indices = @transform_6, window_bounds = array<i64: 1, 8, 32>}]} {
    %c0 = arith.constant 0 : index
    %c0_0 = arith.constant 0 : index
    %c0_1 = arith.constant 0 : index
    %0 = vector.load %arg2[%c0, %c0_0, %c0_1] : memref<1x8x32xf32, #tpu.memory_space<vmem>>, vector<1x8x32xf32>
    %1 = vector.shape_cast %0 : vector<1x8x32xf32> to vector<8x32xf32>
    %2 = arith.truncf %1 : vector<8x32xf32> to vector<8x32xbf16>
    %c0_2 = arith.constant 0 : index
    %c0_3 = arith.constant 0 : index
    %3 = vector.load %arg6[%c0_2, %c0_3] : memref<32x64xbf16, #tpu.memory_space<vmem>>, vector<32x64xbf16>
    %cst = arith.constant dense<0.000000e+00> : vector<8x64xf32>
    %4 = tpu.matmul %2, %3, %cst {dimension_numbers = #tpu.dot_dimension_numbers<[1], [0], [0], [1], [0, 0, 1, 1], [], []>} : vector<8x32xbf16>, vector<32x64xbf16>, vector<8x64xf32> -> vector<8x64xf32>
    %c0_4 = arith.constant 0 : index
    %c0_5 = arith.constant 0 : index
    %5 = vector.load %arg3[%c0_4, %c0_5] : memref<8x8xf32, #tpu.memory_space<vmem>>, vector<8x8xf32>
    %6 = vector.shape_cast %5 : vector<8x8xf32> to vector<8x1x8xf32>
    %7 = vector.shape_cast %6 : vector<8x1x8xf32> to vector<8x1x8xf32>
    %8 = vector.broadcast %7 : vector<8x1x8xf32> to vector<8x4x8xf32>
    %9 = vector.shape_cast %8 : vector<8x4x8xf32> to vector<8x32xf32>
    %c0_6 = arith.constant 0 : index
    %c0_7 = arith.constant 0 : index
    %10 = vector.load %arg4[%c0_6, %c0_7] : memref<8x8xf32, #tpu.memory_space<vmem>>, vector<8x8xf32>
    %11 = vector.shape_cast %10 : vector<8x8xf32> to vector<8x1x8xf32>
    %12 = vector.shape_cast %11 : vector<8x1x8xf32> to vector<8x1x8xf32>
    %13 = vector.broadcast %12 : vector<8x1x8xf32> to vector<8x4x8xf32>
    %14 = vector.shape_cast %13 : vector<8x4x8xf32> to vector<8x32xf32>
    %c0_8 = arith.constant 0 : index
    %c0_9 = arith.constant 0 : index
    %15 = vector.load %arg5[%c0_8, %c0_9] : memref<8x8xf32, #tpu.memory_space<vmem>>, vector<8x8xf32>
    %16 = vector.shape_cast %15 : vector<8x8xf32> to vector<8x1x8xf32>
    %17 = vector.shape_cast %16 : vector<8x1x8xf32> to vector<8x1x8xf32>
    %18 = vector.broadcast %17 : vector<8x1x8xf32> to vector<8x4x8xf32>
    %19 = vector.shape_cast %18 : vector<8x4x8xf32> to vector<8x32xf32>
    %20 = vector.extract_strided_slice %4 {offsets = [0, 0], sizes = [8, 32], strides = [1, 1]} : vector<8x64xf32> to vector<8x32xf32>
    %c31_i32 = arith.constant 31 : i32
    %21 = tpu.dynamic_rotate %20 by %c31_i32 dim 1 : vector<8x32xf32>, i32 -> vector<8x32xf32>
    %c1_i32 = arith.constant 1 : i32
    %22 = tpu.dynamic_rotate %20 by %c1_i32 dim 1 : vector<8x32xf32>, i32 -> vector<8x32xf32>
    %23 = arith.mulf %20, %9 : vector<8x32xf32>
    %24 = arith.mulf %21, %14 : vector<8x32xf32>
    %25 = arith.addf %23, %24 : vector<8x32xf32>
    %26 = arith.mulf %22, %19 : vector<8x32xf32>
    %27 = arith.addf %25, %26 : vector<8x32xf32>
    %28 = arith.truncf %27 : vector<8x32xf32> to vector<8x32xbf16>
    %c0_10 = arith.constant 0 : index
    %c0_11 = arith.constant 0 : index
    %c0_12 = arith.constant 0 : index
    %29 = vector.load %arg7[%c0_10, %c0_11, %c0_12] : memref<1x8x32xbf16, #tpu.memory_space<vmem>>, vector<1x8x32xbf16>
    %30 = vector.shape_cast %29 : vector<1x8x32xbf16> to vector<8x32xbf16>
    %31 = vector.shape_cast %28 : vector<8x32xbf16> to vector<1x8x32xbf16>
    tpu.vector_store %arg7[%c0_10, %c0_11, %c0_12], %31 {strides = array<i32>} : memref<1x8x32xbf16, #tpu.memory_space<vmem>>, vector<1x8x32xbf16>,
    %32 = vector.extract_strided_slice %4 {offsets = [0, 32], sizes = [8, 32], strides = [1, 1]} : vector<8x64xf32> to vector<8x32xf32>
    %33 = arith.truncf %32 : vector<8x32xf32> to vector<8x32xbf16>
    %c0_13 = arith.constant 0 : index
    %c0_14 = arith.constant 0 : index
    %c0_15 = arith.constant 0 : index
    %34 = vector.load %arg8[%c0_13, %c0_14, %c0_15] : memref<1x8x32xbf16, #tpu.memory_space<vmem>>, vector<1x8x32xbf16>
    %35 = vector.shape_cast %34 : vector<1x8x32xbf16> to vector<8x32xbf16>
    %36 = vector.shape_cast %33 : vector<8x32xbf16> to vector<1x8x32xbf16>
    tpu.vector_store %arg8[%c0_13, %c0_14, %c0_15], %36 {strides = array<i32>} : memref<1x8x32xbf16, #tpu.memory_space<vmem>>, vector<1x8x32xbf16>,
    return
  }
  func.func @transform_0(%arg0: i32, %arg1: i32) -> (i32, i32, i32) {
    %c0_i32 = arith.constant 0 : i32
    %c0_i32_0 = arith.constant 0 : i32
    return %arg0, %arg1, %c0_i32 : i32, i32, i32
  }
  func.func @transform_1(%arg0: i32, %arg1: i32) -> (i32, i32) {
    %c0_i32 = arith.constant 0 : i32
    %c0_i32_0 = arith.constant 0 : i32
    return %arg1, %c0_i32 : i32, i32
  }
  func.func @transform_2(%arg0: i32, %arg1: i32) -> (i32, i32) {
    %c0_i32 = arith.constant 0 : i32
    %c0_i32_0 = arith.constant 0 : i32
    return %arg1, %c0_i32 : i32, i32
  }
  func.func @transform_3(%arg0: i32, %arg1: i32) -> (i32, i32) {
    %c0_i32 = arith.constant 0 : i32
    %c0_i32_0 = arith.constant 0 : i32
    return %arg1, %c0_i32 : i32, i32
  }
  func.func @transform_4(%arg0: i32, %arg1: i32) -> (i32, i32) {
    %c0_i32 = arith.constant 0 : i32
    %c0_i32_0 = arith.constant 0 : i32
    %c0_i32_1 = arith.constant 0 : i32
    return %c0_i32, %c0_i32_0 : i32, i32
  }
  func.func @transform_5(%arg0: i32, %arg1: i32) -> (i32, i32, i32) {
    %c0_i32 = arith.constant 0 : i32
    %c0_i32_0 = arith.constant 0 : i32
    return %arg0, %arg1, %c0_i32 : i32, i32, i32
  }
  func.func @transform_6(%arg0: i32, %arg1: i32) -> (i32, i32, i32) {
    %c0_i32 = arith.constant 0 : i32
    %c0_i32_0 = arith.constant 0 : i32
    return %arg0, %arg1, %c0_i32 : i32, i32, i32
  }
}

</mosaic_0001>

<bundles_post_ra>
// kernel: tpu_custom_call.1
= control target key start
LH: loop header
LB: loop body
LE: loop exit
PB: predicated region body
PF: predicated region fallthrough
CT: control target
= control target key end

     0   :  { %12 = vsyncpa [#allocation3], 0  ;;  %s2072_s0 = inlined_call_operand.hbm [shape: f32[2,8,32], index: 0, kind: input, shape index: {}]   ;;  %s2073_s1 = inlined_call_operand.hbm [shape: f32[8,8], index: 1, kind: input, shape index: {}]   ;;  %s2074_s2 = inlined_call_operand.hbm [shape: f32[8,8], index: 2, kind: input, shape index: {}]   ;;  %s2075_s3 = inlined_call_operand.vmem [shape: f32[8,8], index: 3, kind: input, shape index: {}]   ;;  %s2076_s4 = inlined_call_operand.hbm [shape: bf16[32,64], index: 4, kind: input, shape index: {}]   ;;  %s2077_s5 = inlined_call_operand.hbm [shape: bf16[2,8,32], index: 5, kind: output, shape index: {0}]   ;;  %s2078_s6 = inlined_call_operand.hbm [shape: bf16[2,8,32], index: 6, kind: output, shape index: {1}]  }
   0x1   :  { %14 = vsyncpa [#allocation3 + $0x1], 0 }
   0x2   :  { %15 = vsyncpa [#allocation6], 0 }
   0x3   :  { %16 = vsyncpa [#allocation9], 0 }
   0x4   :  { %17 = vsyncpa [#allocation4], 0 }
   0x5   :  { %19 = vsyncpa [#allocation4 + $0x1], 0 }
   0x6   :  { %20 = vsyncpa [#allocation12], 0 }
   0x7   :  { %22 = vsyncpa [#allocation12 + $0x1], 0  ;;  %s1643_s21 = smov 0   ;;  %s1645_s22 = smov 0  }
   0x8   :  { %s1647_s23 = smov 0   ;;  %s1649_s24 = smov 0  }
   0x9   :  { %s1651_s25 = smov 0   ;;  %s1653_s26 = smov 0  }
   0xa LB: > { %s1190_s27 = sadd.s32 4294967295, %s1584_s26   ;;  %s1191_s28 = sadd.s32 4294967294, %s1584_s26   ;;  %s1584_s26 = sphi %s1653_s26, %s28_s26   ;;  %s1580_s25 = sphi %s1651_s25, %s2105_s25   ;;  %s1576_s24 = sphi %s1649_s24, %s2104_s24   ;;  %s1572_s23 = sphi %s1647_s23, %s2103_s23   ;;  %s1568_s22 = sphi %s1645_s22, %s2102_s22   ;;  %s1564_s21 = sphi %s1643_s21, %s2101_s21  }
   0xb   : > { %p62_p0 = scmp.ne.s32.totalorder %s1568_s22, %s1564_s21  ;;  %p1677_p1 = scmp.eq.s32.totalorder %s1190_s27, 0 }
   0xc   : > { %p1681_p2 = scmp.eq.s32.totalorder %s1190_s27, 1  ;;  %p193_p3 = scmp.eq.s32.totalorder %s1191_s28, 1 }
   0xd   : > { %s2084_s29 = scalar_select %p1677_p1, 1, 0 }
   0xe   : > { %s2085_s30 = scalar_select %p1681_p2, 1, 0 }
   0xf   : > { %p1687_p4 = por %p1677_p1, %p62_p0  ;;  %p1192_p5 = scmp.ge.s32.totalorder %s1584_s26, 1 }
  0x10   : > { %p1692_p6 = por %p193_p3, %p62_p0  ;;  %p228_p7 = scmp.lt.s32.totalorder %s1584_s26, 3 }
  0x11   : > { %s2086_s7 = scalar_select %p1687_p4, 1, 0 }
  0x12   : > { %s2087_s8 = scalar_select %p1692_p6, 1, 0 }
  0x13   : > { %p1697_p8 = pnand %p1192_p5, %p228_p7  ;;  %s1586_s10 = smov [#allocation5]  }
  0x14   : > { %2088 = sst [smem:[#allocation18_spill]] %s2087_s8  ;;  %s243_s11 = sshll.u32 %s1586_s10, 4  ;;  %s244_s11 = int_to_ptr.vmem [resolvable:$true] %s243_s11 }
  0x15   : > { %s2089_s9 = scalar_select %p1697_p8, 1, 0 }
  0x16   : > { %p1247_p10 = pneg %p1697_p8  ;;  %s1587_s12 = smov [#allocation7]  }
  0x17   : > { %s256_s13 = sshll.u32 %s1587_s12, 4  ;;  %s1588_s15 = smov [#allocation8]   ;;  %s1710_s13 = int_to_ptr.vmem [resolvable:$true] %s256_s13 }
  0x18   : > { %p1706_p11 = pnand %p1247_p10, %p1677_p1  ;;  %s273_s16 = sshll.u32 %s1588_s15, 4  ;;  %s1712_s16 = int_to_ptr.vmem [resolvable:$true] %s273_s16 }
  0x19   : > { %s1348_s19 = scalar_lea.hbm %s2073_s1, 128 }
  0x1a   : > { %p1349_p12 = scmp.ne.s32.totalorder %s2073_s1, %s1348_s19  ;;  %p1722_p13 = pneg %p1706_p11 }
  0x1b   : > { %p1355_p5 = scmp.lt.u32.totalorder %s1348_s19, %s2073_s1 }
  0x1c   : > { %p1351_p0 = pnand %p1722_p13, %p1349_p12 }
  0x1e   : > { %p1352_p3 = pneg %p1351_p0 }
  0x20   : > { %p1357_p7 = pnand %p1355_p5, %p1352_p3 }
  0x22   : > { %1360 = shalt.err (!%p1357_p7)
}
  0x23   : > { %s1361_s15 = scalar_lea.vmem %s244_s11, 128  ;;  %p1369_p1 = scmp.lt.s32.totalorder %s244_s11, %s244_s11 }
  0x24   : > { %p1362_p10 = scmp.ne.s32.totalorder %s244_s11, %s1361_s15  ;;  %p1370_p4 = scmp.lt.s32.totalorder %s1361_s15, %s1361_s15 }
  0x26   : > { %p1364_p9 = pnand %p1362_p10, %p1722_p13  ;;  %p1371_p8 = por %p1370_p4, %p1369_p1 }
  0x28   : > { %p1365_p6 = pneg %p1364_p9 }
  0x2a   : > { %p1372_p2 = pnand %p1371_p8, %p1365_p6 }
  0x2c   : > { %1375 = shalt.err (!%p1372_p2)
}
  0x2d   : > { %1250 = dma.hbm_to_vmem [thread:$0]  (!%p1706_p11), %s2073_s1, 128, %s244_s11, [#allocation6]  }
  0x2e   : > { %s1376_s27 = scalar_lea.hbm %s2074_s2, 128 }
  0x2f   : > { %p1377_p9 = scmp.ne.s32.totalorder %s2074_s2, %s1376_s27  ;;  %p1383_p2 = scmp.lt.u32.totalorder %s1376_s27, %s2074_s2 }
  0x31   : > { %p1379_p12 = pnand %p1377_p9, %p1722_p13 }
  0x33   : > { %p1380_p1 = pneg %p1379_p12 }
  0x35   : > { %p1385_p4 = pnand %p1383_p2, %p1380_p1 }
  0x37   : > { %1388 = shalt.err (!%p1385_p4)
}
  0x38   : > { %s1389_s11 = scalar_lea.vmem %s1710_s13, 128  ;;  %p1397_p3 = scmp.lt.s32.totalorder %s1710_s13, %s1710_s13 }
  0x39   : > { %p1390_p6 = scmp.ne.s32.totalorder %s1710_s13, %s1389_s11  ;;  %p1398_p5 = scmp.lt.s32.totalorder %s1389_s11, %s1389_s11 }
  0x3b   : > { %p1392_p8 = pnand %p1390_p6, %p1722_p13  ;;  %p1399_p7 = por %p1398_p5, %p1397_p3 }
  0x3d   : > { %p1393_p0 = pneg %p1392_p8 }
  0x3f   : > { %p1400_p10 = pnand %p1399_p7, %p1393_p0 }
  0x41   : > { %1403 = shalt.err (!%p1400_p10)
}
  0x42   : > { %1253 = dma.hbm_to_vmem [thread:$0]  (!%p1706_p11), %s2074_s2, 128, %s1710_s13, [#allocation6]  }
  0x43   : > { %s1404_s20 = scalar_lea.hbm %s2076_s4, 256 }
  0x44   : > { %p1405_p9 = scmp.ne.s32.totalorder %s2076_s4, %s1404_s20  ;;  %p1411_p2 = scmp.lt.u32.totalorder %s1404_s20, %s2076_s4 }
  0x46   : > { %p1407_p12 = pnand %p1405_p9, %p1722_p13 }
  0x48   : > { %p1408_p1 = pneg %p1407_p12 }
  0x4a   : > { %p1413_p4 = pnand %p1411_p2, %p1408_p1 }
  0x4c   : > { %1416 = shalt.err (!%p1413_p4)
}
  0x4d   : > { %s1417_s13 = scalar_lea.vmem %s1712_s16, 256  ;;  %p1425_p3 = scmp.lt.s32.totalorder %s1712_s16, %s1712_s16 }
  0x4e   : > { %p1418_p6 = scmp.ne.s32.totalorder %s1712_s16, %s1417_s13  ;;  %p1426_p5 = scmp.lt.s32.totalorder %s1417_s13, %s1417_s13 }
  0x50   : > { %p1420_p8 = pnand %p1418_p6, %p1722_p13  ;;  %p1427_p7 = por %p1426_p5, %p1425_p3 }
  0x52   : > { %p1421_p0 = pneg %p1420_p8 }
  0x54   : > { %p1428_p10 = pnand %p1427_p7, %p1421_p0 }
  0x56   : > { %1431 = shalt.err (!%p1428_p10)
}
  0x57   : > { %s1589_s11 = smov 64   ;;  %s1590_s28 = smov 4  }
  0x58   : > { %1256 = dma.hbm_to_vmem [thread:$0]  (!%p1706_p11), %s2076_s4, 256, %s1712_s16, [#allocation9], %s1589_s11, %s1589_s11, %s1590_s28  }
  0x59   : > { %s49_s18 = sadd.s32 1, %s1572_s23  ;;  %s40_s19 = sadd.s32 1, %s1580_s25 }
  0x5a   : > { %p56_p13 = scmp.ne.s32.totalorder %s1572_s23, %s1568_s22  ;;  %p42_p9 = scmp.ge.s32.totalorder %s40_s19, 2 }
  0x5b   : > { %p57_p12 = scmp.eq.s32.totalorder %s1584_s26, 0  ;;  %p2092_p1 = scmp.ne.s32.totalorder %s2085_s30, 0 }
  0x5c   : > { %p1271_p4 = scmp.lt.s32.totalorder %s1584_s26, 2  ;;  %s2107_s19 = smov (%p42_p9, %s40_s19), 0 }
  0x5d   : > { %p1791_p2 = por %p2092_p1, %p56_p13  ;;  %p58_p6 = por %p57_p12, %p56_p13 }
  0x5e   : > { %s287_s14 = sand.u32 1, %s1572_s23   ;;  %s44_s27 = ssub.s32 %s1580_s25, %s2107_s19 }
  0x5f   : > { %p47_p8 = scmp.eq.s32.totalorder %s44_s27, 0  ;;  %s1198_s16 = sshll.u32 %s287_s14, 3 }
  0x60   : > { %s1199_s10 = sshll.u32 %s1580_s25, 7  ;;  %s291_s11 = scalar_lea.vmem [#allocation2], %s1198_s16 }
  0x61   : > { %s1803_s12 = scalar_select %p47_p8, %s1572_s23, %s49_s18  }
  0x62   : > { %s1808_s30 = scalar_lea.hbm %s2072_s0, %s1199_s10  ;;  %s299_s28 = sshll.u32 %s291_s11, 4  ;;  %s1810_s28 = int_to_ptr.vmem [resolvable:$true] %s299_s28 }
  0x63   : > { %p1814_p11 = pnand %p1271_p4, %p58_p6  ;;  %s288_s17 = scalar_lea.sflag [#allocation3], %s287_s14 }
  0x64   : > { %s1432_s18 = scalar_lea.hbm %s1808_s30, 128  ;;  %s1437_s10 = scalar_lea.hbm %s2072_s0, 256 }
  0x65   : > { %p1433_p0 = scmp.ne.s32.totalorder %s1808_s30, %s1432_s18  ;;  %p1434_p3 = pneg %p1814_p11 }
  0x66   : > { %p1438_p10 = scmp.lt.u32.totalorder %s1808_s30, %s2072_s0  ;;  %p1439_p13 = scmp.lt.u32.totalorder %s1437_s10, %s1432_s18 }
  0x67   : > { %p1435_p5 = pnand %p1434_p3, %p1433_p0  ;;  %p1441_p12 = scmp.lt.u32.totalorder %s1432_s18, %s1808_s30 }
  0x68   : > { %p1440_p9 = por %p1439_p13, %p1438_p10 }
  0x69   : > { %p1436_p7 = pneg %p1435_p5 }
  0x6a   : > { %p1442_p1 = por %p1441_p12, %p1440_p9 }
  0x6c   : > { %p1443_p4 = pnand %p1442_p1, %p1436_p7 }
  0x6e   : > { %1446 = shalt.err (!%p1443_p4)
}
  0x6f   : > { %s1447_s14 = scalar_lea.vmem %s1810_s28, 128  ;;  %s1591_s11 = smov [#allocation2]  }
  0x70   : > { %p1448_p6 = scmp.ne.s32.totalorder %s1810_s28, %s1447_s14  ;;  %s1452_s27 = sshll.u32 %s1591_s11, 4  ;;  %s1453_s27 = int_to_ptr.vmem [resolvable:$false] %s1452_s27 }
  0x71   : > { %s1454_s16 = scalar_lea.vmem %s1453_s27, 256  ;;  %p1455_p5 = scmp.lt.s32.totalorder %s1810_s28, %s1453_s27 }
  0x72   : > { %p1450_p8 = pnand %p1448_p6, %p1434_p3  ;;  %p1456_p10 = scmp.lt.s32.totalorder %s1454_s16, %s1447_s14 }
  0x74   : > { %p1451_p0 = pneg %p1450_p8  ;;  %p1457_p13 = por %p1456_p10, %p1455_p5 }
  0x76   : > { %p1458_p9 = pnand %p1457_p13, %p1451_p0 }
  0x78   : > { %1461 = shalt.err (!%p1458_p9)
}
  0x79   : > { %1260 = dma.hbm_to_vmem [thread:$0]  (!%p1814_p11), %s1808_s30, 128, %s1810_s28, %s288_s17  }
  0x7a   : > { %p2095_p7 = scmp.ne.s32.totalorder %s2089_s9, 0 }
  0x7b   : > { %s1846_s18 = sand.u32 (!%p2095_p7), 1, %s1568_s22   ;;  %p2096_p3 = scmp.ne.s32.totalorder (!%p2095_p7), %s2086_s7, 0 }
  0x7c   : > { %308 = sbr.rel (%p2095_p7) target bundleno = 748 (0x2ec), region = 40  ;;  %s1201_s10 = sshll.u32 (!%p2095_p7), %s1846_s18, 3 }
  0x7d   : > { %s311_s15 = scalar_lea.sflag (!%p2095_p7), [#allocation3], %s1846_s18  ;;  %s314_s13 = scalar_lea.vmem (!%p2095_p7), [#allocation2], %s1201_s10 }
  0x83   : > { %1543 = dma.done.wait (%p2096_p3), %s311_s15, 128  }
  0x84   : > { %1545 = vsyncadd (%p2096_p3), %s311_s15, 4294967168  ;;  %p2097_p12 = scmp.ne.s32.totalorder %s2084_s29, 0 }
  0x86   : > { %1547 = dma.done.wait (%p2097_p12), [#allocation6], 256  }
  0x87   : > { %1549 = vsyncadd (%p2097_p12), [#allocation6], 4294967040 }
  0x88   : > { %1551 = dma.done.wait (%p2097_p12), [#allocation9], 256  }
  0x89   : > { %1553 = vsyncadd (%p2097_p12), [#allocation9], 4294967040  ;;  %v437_v0 = vlaneseq  ;;  %v1592_v1 = vmov 0.0   ;;  %vm1593_vm0 = vmmov 0   ;;  %v1594_v2 = vmov 1966171168  }
  0x8a   : > { %1221 = vmatprep.subr.bf16.mxu0 %v1592_v1  ;;  %1225 = vmatprep.mubr.msk.bf16.mxu0 %vm1593_vm0, %v1592_v1  ;;  %v435_v3 = vunpack.c.l.s4 %v1594_v2  ;;  %v1343_v7 = vld [vmem:[#allocation8] sm:$0xff]   ;;  %v1344_v8 = vld [vmem:[#allocation8 + $0x8] sm:$0xff]   ;;  %v1595_v10 = vmov 1983009808   ;;  %v608_v12 = vld [vmem:[#allocation7] sm:$0xff]  ;;  %vm387_vm1 = vcmask 261120  }
  0x8b   : > { %v438_v4 = vshrl.u32 %v437_v0, 7  ;;  %1222 = vmatpush3.bf16.msra.mxu0 %v1343_v7  ;;  %v369_v9 = vld [vmem:[%s314_s13] sm:$0xff]  ;;  %v524_v11 = vunpack.c.l.s4 %v1595_v10  ;;  %v610_v13 = vcombine.high %v608_v12, %v608_v12  ;;  %v1596_v21 = vmov 1934713408   ;;  %s1597_s29 = smov 8   ;;  %s1598_s7 = smov 24  }
  0x8c   : > { %v436_v5 = vunpack.c.0.s8 %v435_v3  ;;  %1223 = vmatprep.subr.bf16.mxu0 %v1592_v1  ;;  %v370_v16 = vpack.c.bf16 %v369_v9, %v369_v9  ;;  %v557_v22 = vunpack.c.l.s4 %v1596_v21  ;;  %s1599_s9 = smov 16   ;;  %v782_v62 = vld [vmem:[%s2075_s3] sm:$0xff]  ;;  %vm602_vm2 = vcmask 64512   ;;  %s1600_s8 = smov 1  }
  0x8d   : > { %v1865_v15 = vsub.s32 0, %v438_v4  ;;  %v525_v20 = vunpack.c.0.s8 %v524_v11  ;;  %v784_v63 = vcombine.high %v782_v62, %v782_v62  ;;  %vm604_vm3 = vcmask 130048   ;;  %s1601_s17 = smov 32   ;;  %s1602_s14 = smov 31  }
  0x8e   : > { %v1862_v6 = vsub.s32 %v436_v5, %v438_v4  ;;  %v558_v33 = vunpack.c.0.s8 %v557_v22  ;;  %vm606_vm4 = vcmask 195584   ;;  %vm956_vm5 = vcmask 1047808   ;;  %s1603_s11 = smov 127   ;;  %s1604_s27 = smov 97  }
  0x8f   : > { %1224 = vmatpush3.bf16.msra.mxu0 %v1344_v8  ;;  %v1874_v32 = vsub.s32 %v525_v20, %v438_v4  ;;  %s1605_s16 = smov 96   ;;  %s1205_s10 = sshll.u32 %s1846_s18, 2  ;;  %vm985_vm6 = vcmask 257024  }
  0x90   : > { %v617_v14 = vrot.slane %v608_v12, %v1862_v6  ;;  %v624_v17 = vrot.slane %v610_v13, %v1862_v6  ;;  %v1883_v45 = vsub.s32 %v558_v33, %v438_v4  ;;  %v791_v0 = vrot.slane %v782_v62, %v1862_v6  ;;  %s1213_s15 = sshll.u32 %s1576_s24, 6  ;;  %s363_s13 = scalar_lea.vmem [#allocation11], %s1205_s10 }
  0x91   : > { %v798_v1 = vrot.slane %v784_v63, %v1862_v6  ;;  %s1984_s30 = scalar_lea.hbm %s2078_s6, %s1213_s15  ;;  %s1988_s28 = scalar_lea.vmem [#allocation10], %s1205_s10 }
  0x92   : > { %v625_v18 = vcombine.high %v617_v14, %v617_v14  ;;  %v633_v19 = vrot.slane %v617_v14, %v1862_v6  ;;  %v626_v23 = vcombine.high %v624_v17, %v624_v17  ;;  %v640_v24 = vrot.slane %v624_v17, %v1862_v6  ;;  %1226 = vmatmul.mubr.msk.bf16.vlgmr.msra.gmra.mrb[0].mxu0 %vm387_vm1, %v370_v16 }
  0x93   : > { %v799_v2 = vcombine.high %v791_v0, %v791_v0  ;;  %v800_v3 = vcombine.high %v798_v1, %v798_v1  ;;  %v807_v4 = vrot.slane %v791_v0, %v1862_v6  ;;  %v814_v5 = vrot.slane %v798_v1, %v1862_v6 }
  0x94   : > { %v647_v25 = vrot.slane %v625_v18, %v1862_v6  ;;  %v655_v26 = vcombine.high %v633_v19, %v633_v19  ;;  %v662_v27 = vrot.slane %v633_v19, %v1865_v15  ;;  %v654_v28 = vrot.slane %v626_v23, %v1862_v6 }
  0x95   : > { %v656_v29 = vcombine.high %v640_v24, %v640_v24  ;;  %v678_v35 = vrot.slane %v640_v24, %v1865_v15  ;;  %v821_v7 = vrot.slane %v799_v2, %v1862_v6  ;;  %v828_v8 = vrot.slane %v800_v3, %v1862_v6 }
  0x96   : > { %v657_v30 = vcombine.high %v647_v25, %v647_v25  ;;  %v666_v31 = vrot.slane %v647_v25, %v1865_v15  ;;  %v670_v34 = vrot.slane %v655_v26, %v1865_v15  ;;  %v658_v36 = vcombine.high %v654_v28, %v654_v28 }
  0x97   : > { %v682_v38 = vrot.slane %v654_v28, %v1865_v15  ;;  %v686_v39 = vrot.slane %v656_v29, %v1865_v15  ;;  %v829_v9 = vcombine.high %v807_v4, %v807_v4  ;;  %v830_v10 = vcombine.high %v814_v5, %v814_v5 }
  0x98   : > { %v674_v37 = vrot.slane %v657_v30, %v1865_v15  ;;  %v699_v40 = vcombine.low %v662_v27, %v670_v34  ;;  %v690_v41 = vrot.slane %v658_v36, %v1865_v15  ;;  %v831_v11 = vcombine.high %v821_v7, %v821_v7 }
  0x99   : > { %v715_v43 = vcombine.low %v678_v35, %v686_v39  ;;  %v832_v12 = vcombine.high %v828_v8, %v828_v8  ;;  %v836_v13 = vrot.slane %v807_v4, %v1865_v15  ;;  %v840_v14 = vrot.slane %v821_v7, %v1865_v15 }
  0x9a   : > { %v707_v42 = vcombine.low %v666_v31, %v674_v37  ;;  %v706_v44 = vrot.slane %v699_v40, %v1874_v32  ;;  %v723_v48 = vcombine.low %v682_v38, %v690_v41  ;;  %v844_v16 = vrot.slane %v829_v9, %v1865_v15 }
  0x9b   : > { %v722_v47 = vrot.slane %v715_v43, %v1874_v32  ;;  %v848_v17 = vrot.slane %v831_v11, %v1865_v15  ;;  %v852_v18 = vrot.slane %v814_v5, %v1865_v15  ;;  %v856_v19 = vrot.slane %v828_v8, %v1865_v15 }
  0x9c   : > { %v714_v46 = vrot.slane %v707_v42, %v1874_v32  ;;  %v730_v49 = vrot.slane %v723_v48, %v1874_v32  ;;  %v860_v20 = vrot.slane %v830_v10, %v1865_v15  ;;  %v864_v21 = vrot.slane %v832_v12, %v1865_v15 }
  0x9d   : > { %v873_v22 = vcombine.low %v836_v13, %v844_v16  ;;  %v881_v23 = vcombine.low %v840_v14, %v848_v17 }
  0x9e   : > { %v731_v50 = vcombine.low %v706_v44, %v714_v46  ;;  %v732_v51 = vcombine.high %v706_v44, %v714_v46  ;;  %v747_v53 = vcombine.low %v722_v47, %v730_v49  ;;  %v748_v55 = vcombine.high %v722_v47, %v730_v49  ;;  %v431_v49 = vld [vmem:[#allocation5] sm:$0xff] }
  0x9f   : > { %v889_v24 = vcombine.low %v852_v18, %v860_v20  ;;  %v897_v25 = vcombine.low %v856_v19, %v864_v21  ;;  %v880_v26 = vrot.slane %v873_v22, %v1874_v32  ;;  %v888_v27 = vrot.slane %v881_v23, %v1874_v32 }
  0xa0   : > { %v1889_v52 = vrot.slane %v731_v50, %v1883_v45  ;;  %v746_v54 = vrot.slane %v732_v51, %v1883_v45  ;;  %v755_v56 = vrot.slane %v747_v53, %v1883_v45  ;;  %v762_v57 = vrot.slane %v748_v55, %v1883_v45 }
  0xa1   : > { %v896_v28 = vrot.slane %v889_v24, %v1874_v32  ;;  %v904_v29 = vrot.slane %v897_v25, %v1874_v32  ;;  %v905_v30 = vcombine.low %v880_v26, %v888_v27  ;;  %v906_v35 = vcombine.high %v880_v26, %v888_v27 }
  0xa2   : > { %v764_v58 = vcombine.high %v1889_v52, %v755_v56  ;;  %v763_v59 = vcombine.low %v1889_v52, %v755_v56  ;;  %v766_v60 = vcombine.high %v746_v54, %v762_v57  ;;  %v765_v61 = vcombine.low %v746_v54, %v762_v57 }
  0xa3   : > { %v921_v31 = vcombine.low %v896_v28, %v904_v29  ;;  %v1921_v33 = vrot.slane %v905_v30, %v1883_v45  ;;  %v922_v36 = vcombine.high %v896_v28, %v904_v29  ;;  %v1929_v38 = vrot.slane %v906_v35, %v1883_v45 }
  0xa4   : > { %768 = vrot.lane.b32.xlu0 %v764_v58, %s1597_s29  ;;  %776 = vrot.lane.b32.xlu1 %v766_v60, %s1598_s7  ;;  %v433_v50 = vcombine.high %v431_v49, %v431_v49  ;;  %v440_v51 = vrot.slane %v431_v49, %v1862_v6 }
  0xa5   : > { %v1924_v34 = vrot.slane %v921_v31, %v1883_v45  ;;  %v1932_v39 = vrot.slane %v922_v36, %v1883_v45 }
  0xa6   : > { %v447_v52 = vrot.slane %v433_v50, %v1862_v6  ;;  %v448_v53 = vcombine.high %v440_v51, %v440_v51  ;;  %v456_v55 = vrot.slane %v440_v51, %v1862_v6 }
  0xa7   : > { %v938_v37 = vcombine.high %v1921_v33, %v1924_v34  ;;  %v939_v40 = vcombine.low %v1929_v38, %v1932_v39  ;;  %v940_v41 = vcombine.high %v1929_v38, %v1932_v39 }
  0xa8   : > { %772 = vrot.lane.b32.xlu0 %v765_v61, %s1599_s9  ;;  %v449_v54 = vcombine.high %v447_v52, %v447_v52  ;;  %v463_v56 = vrot.slane %v447_v52, %v1862_v6  ;;  %v470_v57 = vrot.slane %v448_v53, %v1862_v6  ;;  %v485_v63 = vrot.slane %v456_v55, %v1865_v15 }
  0xaa   : > { %v477_v58 = vrot.slane %v449_v54, %v1862_v6  ;;  %v479_v60 = vcombine.high %v463_v56, %v463_v56  ;;  %v480_v61 = vcombine.high %v470_v57, %v470_v57  ;;  %v489_v0 = vrot.slane %v470_v57, %v1865_v15 }
  0xab   : > { %v501_v3 = vrot.slane %v463_v56, %v1865_v15 }
  0xac   : > { %942 = vrot.lane.b32.xlu0 %v938_v37, %s1597_s29  ;;  %v481_v62 = vcombine.high %v477_v58, %v477_v58  ;;  %v497_v2 = vrot.slane %v480_v61, %v1865_v15  ;;  %v505_v4 = vrot.slane %v477_v58, %v1865_v15  ;;  %v509_v5 = vrot.slane %v479_v60, %v1865_v15 }
  0xae   : > { %v513_v6 = vrot.slane %v481_v62, %v1865_v15  ;;  %v530_v8 = vcombine.low %v489_v0, %v497_v2  ;;  %v538_v9 = vcombine.low %v501_v3, %v509_v5 }
  0xb0   : > { %950 = vrot.lane.b32.xlu0 %v940_v41, %s1598_s7  ;;  %v546_v10 = vcombine.low %v505_v4, %v513_v6  ;;  %v537_v12 = vrot.slane %v530_v8, %v1874_v32  ;;  %v545_v13 = vrot.slane %v538_v9, %v1874_v32 }
  0xb2   : > { %v553_v14 = vrot.slane %v546_v10, %v1874_v32 }
  0xb4   : > { %v570_v17 = vcombine.low %v545_v13, %v553_v14 }
  0xb6   : > { %v578_v19 = vrot.slane %v570_v17, %v1883_v45 }
 0x116   : > { %v769_v42 = vpop.permute.xlu0 %768  ;;  %v777_v44 = vpop.permute.xlu1 %776 }
 0x117   : > { %v779_v43 = vsel %vm602_vm2, %v763_v59, %v769_v42  ;;  %v478_v59 = vcombine.high %v456_v55, %v456_v55 }
 0x119   : > { %v493_v1 = vrot.slane %v478_v59, %v1865_v15  ;;  %v571_v15 = vcombine.high %v545_v13, %v553_v14 }
 0x11a   : > { %v773_v46 = vpop.permute.xlu0 %772 }
 0x11b   : > { %v780_v47 = vsel %vm604_vm3, %v779_v43, %v773_v46  ;;  %v522_v7 = vcombine.low %v485_v63, %v493_v1  ;;  %v585_v23 = vrot.slane %v571_v15, %v1883_v45 }
 0x11c   : > { %v781_v48 = vsel %vm606_vm4, %v780_v47, %v777_v44 }
 0x11d   : > { %965 = vrot.lane.b32.xlu0 %v781_v48, %s1600_s8  ;;  %v529_v11 = vrot.slane %v522_v7, %v1874_v32  ;;  %s1015_s8 = sshll.u32 %s1988_s28, 4  ;;  %s2023_s8 = int_to_ptr.vmem [resolvable:$true] %s1015_s8 }
 0x11e   : > { %v943_v29 = vpop.permute.xlu0 %942 }
 0x11f   : > { %v554_v16 = vcombine.low %v529_v11, %v537_v12  ;;  %v555_v20 = vcombine.high %v529_v11, %v537_v12 }
 0x121   : > { %v562_v18 = vrot.slane %v554_v16, %v1883_v45  ;;  %v569_v22 = vrot.slane %v555_v20, %v1883_v45  ;;  %v937_v45 = vcombine.low %v1921_v33, %v1924_v34 }
 0x122   : > { %v951_v35 = vpop.permute.xlu0 %950 }
 0x123   : > { %v587_v21 = vcombine.high %v562_v18, %v578_v19  ;;  %v588_v24 = vcombine.low %v569_v22, %v585_v23  ;;  %v589_v25 = vcombine.high %v569_v22, %v585_v23  ;;  %v953_v36 = vsel %vm602_vm2, %v937_v45, %v943_v29 }
 0x124   : > { %v586_v46 = vcombine.low %v562_v18, %v578_v19 }
 0x125   : > { %591 = vrot.lane.b32.xlu0 %v587_v21, %s1597_s29  ;;  %s1029_s29 = sshll.u32 %s363_s13, 4  ;;  %s1986_s29 = int_to_ptr.vmem [resolvable:$true] %s1029_s29 }
 0x129   : > { %599 = vrot.lane.b32.xlu0 %v589_v25, %s1598_s7 }
 0x165   : > { %v425_v26 = vpop.f32.mrb[0].mxu0 }
 0x166   : > { %957 = vrot.lane.b32.xlu1 %v425_v26, %s1601_s17  ;;  %v1227_v32 = vpop.f32.mrb[1].mxu0  ;;  %v1217_v44 = vpack.c.bf16 %v425_v26, %v425_v26 }
 0x167   : > { %v428_v27 = vpop.f32.mrb[2].mxu0 }
 0x168   : > { %v1228_v28 = vpop.f32.mrb[3].mxu0 }
 0x16a   : > { %946 = vrot.lane.b32.xlu1 %v939_v40, %s1599_s9 }
 0x18f   : > { %v966_v41 = vpop.permute.xlu0 %965 }
 0x197   : > { %v592_v47 = vpop.permute.xlu0 %591 }
 0x198   : > { %v603_v48 = vsel %vm602_vm2, %v586_v46, %v592_v47 }
 0x19b   : > { %v600_v51 = vpop.permute.xlu0 %599 }
 0x1d8   : > { %v958_v30 = vpop.permute.xlu1 %957 }
 0x1d9   : > { %v959_v31 = vsel %vm956_vm5, %v958_v30, %v425_v26 }
 0x1da   : > { %960 = vrot.lane.b32.xlu1 %v959_v31, %s1601_s17  ;;  %s1001_s17 = scalar_lea.sflag [#allocation12], %s1846_s18 }
 0x1dc   : > { %v947_v37 = vpop.permute.xlu1 %946 }
 0x1dd   : > { %v954_v38 = vsel %vm604_vm3, %v953_v36, %v947_v37 }
 0x1de   : > { %v955_v39 = vsel %vm606_vm4, %v954_v38, %v951_v35 }
 0x1df   : > { %975 = vrot.lane.b32.xlu1 %v955_v39, %s1602_s14  ;;  %s1462_s14 = scalar_lea.vmem %s1986_s29, 64 }
 0x1e0   : > { %p1463_p11 = scmp.ne.s32.totalorder %s1986_s29, %s1462_s14 }
 0x1e2   : > { %p1464_p1 = pnand %p1463_p11, %p1791_p2 }
 0x1e3   : > { %595 = vrot.lane.b32.xlu1 %v588_v24, %s1599_s9 }
 0x1e4   : > { %p1465_p4 = pneg %p1464_p1 }
 0x24c   : > { %v961_v40 = vpop.permute.xlu1 %960 }
 0x24d   : > { %v962_v42 = vsel %vm956_vm5, %v961_v40, %v425_v26 }
 0x24e   : > { %v968_v43 = vmul.f32 %v966_v41, %v962_v42 }
 0x250   : > { %970 = vrot.lane.b32.xlu1 %v968_v43, %s1603_s11  ;;  %s1606_s11 = smov [#allocation11]  }
 0x251   : > { %v976_v33 = vpop.permute.xlu1 %975 }
 0x252   : > { %v978_v34 = vmul.f32 %v976_v33, %v962_v42 }
 0x254   : > { %980 = vrot.lane.b32.xlu0 %v978_v34, %s1604_s27  ;;  %991 = vrot.lane.b32.xlu1 %v1217_v44, %s1605_s16  ;;  %s1466_s27 = sshll.u32 %s1606_s11, 4  ;;  %s1467_s27 = int_to_ptr.vmem [resolvable:$false] %s1466_s27 }
 0x255   : > { %v596_v49 = vpop.permute.xlu1 %595  ;;  %s1468_s16 = scalar_lea.vmem %s1467_s27, 128  ;;  %p1469_p6 = scmp.lt.s32.totalorder %s1986_s29, %s1467_s27 }
 0x256   : > { %v605_v50 = vsel %vm604_vm3, %v603_v48, %v596_v49  ;;  %p1470_p8 = scmp.lt.s32.totalorder %s1468_s16, %s1462_s14 }
 0x257   : > { %v607_v52 = vsel %vm606_vm4, %v605_v50, %v600_v51 }
 0x258   : > { %v963_v54 = vmul.f32 %v607_v52, %v425_v26  ;;  %p1471_p0 = por %p1470_p8, %p1469_p6 }
 0x25a   : > { %p1472_p5 = pnand %p1471_p0, %p1465_p4 }
 0x2c2   : > { %v971_v53 = vpop.permute.xlu1 %970 }
 0x2c3   : > { %v973_v55 = vadd.f32 %v971_v53, %v963_v54 }
 0x2c6   : > { %v981_v56 = vpop.permute.xlu0 %980  ;;  %v992_v57 = vpop.permute.xlu1 %991 }
 0x2c7   : > { %v983_v58 = vadd.f32 %v981_v56, %v973_v55  ;;  %994 = vst.msk [vmem:[%s363_s13] sm:$0xf] %vm985_vm6, %v992_v57 }
 0x2c8   : > { %1475 = shalt.err (!%p1472_p5)
}
 0x2c9   : > { %s1476_s10 = scalar_lea.hbm %s1984_s30, 64  ;;  %s1480_s9 = scalar_lea.hbm %s2078_s6, 128 }
 0x2ca   : > { %p1477_p10 = scmp.ne.s32.totalorder %s1984_s30, %s1476_s10  ;;  %p1481_p7 = scmp.lt.u32.totalorder %s1984_s30, %s2078_s6 }
 0x2cb   : > { %p1482_p3 = scmp.lt.u32.totalorder %s1480_s9, %s1476_s10  ;;  %p1484_p11 = scmp.lt.u32.totalorder %s1476_s10, %s1984_s30 }
 0x2cc   : > { %p1478_p13 = pnand %p1477_p10, %p1791_p2 }
 0x2cd   : > { %p1483_p12 = por %p1482_p3, %p1481_p7 }
 0x2ce   : > { %p1479_p9 = pneg %p1478_p13 }
 0x2cf   : > { %p1485_p1 = por %p1484_p11, %p1483_p12 }
 0x2d1   : > { %p1486_p4 = pnand %p1485_p1, %p1479_p9 }
 0x2d3   : > { %1489 = shalt.err (!%p1486_p4)
}
 0x2d4   : > { %1244 = dma.vmem_to_hbm [thread:$0]  (%p1791_p2), %s1986_s29, 64, %s1984_s30, %s1001_s17   ;;  %v984_v59 = vpack.c.bf16 %v983_v58, %v983_v58 }
 0x2d5   : > { %s2019_s13 = scalar_lea.hbm %s2077_s5, %s1213_s15  ;;  %s996_s10 = scalar_lea.sflag [#allocation4], %s1846_s18 }
 0x2d6   : > { %986 = vst.msk [vmem:[%s1988_s28] sm:$0xf] %vm985_vm6, %v984_v59  ;;  %s1490_s7 = scalar_lea.vmem %s2023_s8, 64  ;;  %s1607_s24 = smov [#allocation10]  }
 0x2d7   : > { %p1491_p6 = scmp.ne.s32.totalorder %s2023_s8, %s1490_s7  ;;  %s1494_s29 = sshll.u32 %s1607_s24, 4  ;;  %s1495_s29 = int_to_ptr.vmem [resolvable:$false] %s1494_s29 }
 0x2d8   : > { %s1496_s30 = scalar_lea.vmem %s1495_s29, 128  ;;  %p1497_p5 = scmp.lt.s32.totalorder %s2023_s8, %s1495_s29 }
 0x2d9   : > { %p1492_p8 = pnand %p1491_p6, %p1791_p2  ;;  %p1498_p10 = scmp.lt.s32.totalorder %s1496_s30, %s1490_s7 }
 0x2db   : > { %p1493_p0 = pneg %p1492_p8  ;;  %p1499_p13 = por %p1498_p10, %p1497_p5 }
 0x2dd   : > { %p1500_p9 = pnand %p1499_p13, %p1493_p0 }
 0x2df   : > { %1503 = shalt.err (!%p1500_p9)
}
 0x2e0   : > { %s1504_s18 = scalar_lea.hbm %s2019_s13, 64  ;;  %s1508_s17 = scalar_lea.hbm %s2077_s5, 128 }
 0x2e1   : > { %p1505_p7 = scmp.ne.s32.totalorder %s2019_s13, %s1504_s18  ;;  %p1509_p11 = scmp.lt.u32.totalorder %s2019_s13, %s2077_s5 }
 0x2e2   : > { %p1510_p1 = scmp.lt.u32.totalorder %s1508_s17, %s1504_s18  ;;  %p1512_p6 = scmp.lt.u32.totalorder %s1504_s18, %s2019_s13 }
 0x2e3   : > { %p1506_p3 = pnand %p1505_p7, %p1791_p2 }
 0x2e4   : > { %p1511_p4 = por %p1510_p1, %p1509_p11 }
 0x2e5   : > { %p1507_p12 = pneg %p1506_p3 }
 0x2e6   : > { %p1513_p8 = por %p1512_p6, %p1511_p4 }
 0x2e8   : > { %p1514_p0 = pnand %p1513_p8, %p1507_p12 }
 0x2ea   : > { %1517 = shalt.err (!%p1514_p0)
}
 0x2eb   : > { %1243 = dma.vmem_to_hbm [thread:$0]  (%p1791_p2), %s2023_s8, 64, %s2019_s13, %s996_s10  }
 0x2ec PF: > { %s2098_s27 = sld [smem:[#allocation18_spill]]  ;;  %s1041_s14 = sand.u32 1, %s1564_s21  }
 0x2ed   : > { %p2100_p10 = scmp.ge.s32.totalorder %s1584_s26, 2  ;;  %s1042_s16 = scalar_lea.sflag [#allocation4], %s1041_s14 }
 0x2f2   : > { %p2099_p5 = scmp.ne.s32.totalorder %s2098_s27, 0 }
 0x2f4   : > { %p1262_p13 = pnand %p2100_p10, %p2099_p5 }
 0x2f6   : > { %1555 = dma.done.wait (!%p1262_p13), %s1042_s16, 64  }
 0x2f7   : > { %1557 = vsyncadd (!%p1262_p13), %s1042_s16, 4294967232  ;;  %s1051_s7 = scalar_lea.sflag [#allocation12], %s1041_s14 }
 0x2f8   : > { %1559 = dma.done.wait (!%p1262_p13), %s1051_s7, 64  }
 0x2f9   : > { %1561 = vsyncadd (!%p1262_p13), %s1051_s7, 4294967232  ;;  %s28_s26 = sadd.s32 1, %s1584_s26   ;;  %s2101_s21 = smov %s1568_s22 }
 0x2fa   : > { %p25_p9 = scmp.ge.s32.totalorder %s28_s26, 4   ;;  %s2102_s22 = smov %s1572_s23 }
 0x2fb   : > { %s2103_s23 = smov %s1803_s12  ;;  %s2104_s24 = smov %s1580_s25 }
 0x2fc   : > { %s2105_s25 = smov %s2107_s19  ;;  %27 = sbr.rel (!%p25_p9) target bundleno = 10 (0xa), region = 119 }
 0x303   :  { %1056 = vsyncpa [#allocation3], 1 }
 0x304   :  { %1058 = vsyncpa [#allocation3 + $0x1], 1 }
 0x305   :  { %1059 = vsyncpa [#allocation6], 1 }
 0x306   :  { %1060 = vsyncpa [#allocation9], 1 }
 0x307   :  { %1061 = vsyncpa [#allocation4], 1 }
 0x308   :  { %1063 = vsyncpa [#allocation4 + $0x1], 1 }
 0x309   :  { %1064 = vsyncpa [#allocation12], 1 }
 0x30a   :  { %1066 = vsyncpa [#allocation12 + $0x1], 1 }

// kernel: tpu_custom_call.1
= control target key start
LH: loop header
LB: loop body
LE: loop exit
PB: predicated region body
PF: predicated region fallthrough
CT: control target
= control target key end

     0   :  { %12 = vsyncpa [#allocation3], 0  ;;  %s2072_s0 = inlined_call_operand.hbm [shape: f32[2,8,32], index: 0, kind: input, shape index: {}]   ;;  %s2073_s1 = inlined_call_operand.hbm [shape: f32[8,8], index: 1, kind: input, shape index: {}]   ;;  %s2074_s2 = inlined_call_operand.hbm [shape: f32[8,8], index: 2, kind: input, shape index: {}]   ;;  %s2075_s3 = inlined_call_operand.vmem [shape: f32[8,8], index: 3, kind: input, shape index: {}]   ;;  %s2076_s4 = inlined_call_operand.hbm [shape: bf16[32,64], index: 4, kind: input, shape index: {}]   ;;  %s2077_s5 = inlined_call_operand.hbm [shape: bf16[2,8,32], index: 5, kind: output, shape index: {0}]   ;;  %s2078_s6 = inlined_call_operand.hbm [shape: bf16[2,8,32], index: 6, kind: output, shape index: {1}]  }
   0x1   :  { %14 = vsyncpa [#allocation3 + $0x1], 0 }
   0x2   :  { %15 = vsyncpa [#allocation6], 0 }
   0x3   :  { %16 = vsyncpa [#allocation9], 0 }
   0x4   :  { %17 = vsyncpa [#allocation4], 0 }
   0x5   :  { %19 = vsyncpa [#allocation4 + $0x1], 0 }
   0x6   :  { %20 = vsyncpa [#allocation12], 0 }
   0x7   :  { %22 = vsyncpa [#allocation12 + $0x1], 0  ;;  %s1643_s21 = smov 0   ;;  %s1645_s22 = smov 0  }
   0x8   :  { %s1647_s23 = smov 0   ;;  %s1649_s24 = smov 0  }
   0x9   :  { %s1651_s25 = smov 0   ;;  %s1653_s26 = smov 0  }
   0xa LB: > { %s1190_s27 = sadd.s32 4294967295, %s1584_s26   ;;  %s1191_s28 = sadd.s32 4294967294, %s1584_s26   ;;  %s1584_s26 = sphi %s1653_s26, %s28_s26   ;;  %s1580_s25 = sphi %s1651_s25, %s2105_s25   ;;  %s1576_s24 = sphi %s1649_s24, %s2104_s24   ;;  %s1572_s23 = sphi %s1647_s23, %s2103_s23   ;;  %s1568_s22 = sphi %s1645_s22, %s2102_s22   ;;  %s1564_s21 = sphi %s1643_s21, %s2101_s21  }
   0xb   : > { %p62_p0 = scmp.ne.s32.totalorder %s1568_s22, %s1564_s21  ;;  %p1677_p1 = scmp.eq.s32.totalorder %s1190_s27, 0 }
   0xc   : > { %p1681_p2 = scmp.eq.s32.totalorder %s1190_s27, 1  ;;  %p193_p3 = scmp.eq.s32.totalorder %s1191_s28, 1 }
   0xd   : > { %s2084_s29 = scalar_select %p1677_p1, 1, 0 }
   0xe   : > { %s2085_s30 = scalar_select %p1681_p2, 1, 0 }
   0xf   : > { %p1687_p4 = por %p1677_p1, %p62_p0  ;;  %p1192_p5 = scmp.ge.s32.totalorder %s1584_s26, 1 }
  0x10   : > { %p1692_p6 = por %p193_p3, %p62_p0  ;;  %p228_p7 = scmp.lt.s32.totalorder %s1584_s26, 3 }
  0x11   : > { %s2086_s7 = scalar_select %p1687_p4, 1, 0 }
  0x12   : > { %s2087_s8 = scalar_select %p1692_p6, 1, 0 }
  0x13   : > { %p1697_p8 = pnand %p1192_p5, %p228_p7  ;;  %s1586_s10 = smov [#allocation5]  }
  0x14   : > { %2088 = sst [smem:[#allocation18_spill]] %s2087_s8  ;;  %s243_s11 = sshll.u32 %s1586_s10, 4  ;;  %s244_s11 = int_to_ptr.vmem [resolvable:$true] %s243_s11 }
  0x15   : > { %s2089_s9 = scalar_select %p1697_p8, 1, 0 }
  0x16   : > { %p1247_p10 = pneg %p1697_p8  ;;  %s1587_s12 = smov [#allocation7]  }
  0x17   : > { %s256_s13 = sshll.u32 %s1587_s12, 4  ;;  %s1588_s15 = smov [#allocation8]   ;;  %s1710_s13 = int_to_ptr.vmem [resolvable:$true] %s256_s13 }
  0x18   : > { %p1706_p11 = pnand %p1247_p10, %p1677_p1  ;;  %s273_s16 = sshll.u32 %s1588_s15, 4  ;;  %s1712_s16 = int_to_ptr.vmem [resolvable:$true] %s273_s16 }
  0x19   : > { %s1348_s19 = scalar_lea.hbm %s2073_s1, 128 }
  0x1a   : > { %p1349_p12 = scmp.ne.s32.totalorder %s2073_s1, %s1348_s19  ;;  %p1722_p13 = pneg %p1706_p11 }
  0x1b   : > { %p1355_p5 = scmp.lt.u32.totalorder %s1348_s19, %s2073_s1 }
  0x1c   : > { %p1351_p0 = pnand %p1722_p13, %p1349_p12 }
  0x1e   : > { %p1352_p3 = pneg %p1351_p0 }
  0x20   : > { %p1357_p7 = pnand %p1355_p5, %p1352_p3 }
  0x22   : > { %1360 = shalt.err (!%p1357_p7)
}
  0x23   : > { %s1361_s15 = scalar_lea.vmem %s244_s11, 128  ;;  %p1369_p1 = scmp.lt.s32.totalorder %s244_s11, %s244_s11 }
  0x24   : > { %p1362_p10 = scmp.ne.s32.totalorder %s244_s11, %s1361_s15  ;;  %p1370_p4 = scmp.lt.s32.totalorder %s1361_s15, %s1361_s15 }
  0x26   : > { %p1364_p9 = pnand %p1362_p10, %p1722_p13  ;;  %p1371_p8 = por %p1370_p4, %p1369_p1 }
  0x28   : > { %p1365_p6 = pneg %p1364_p9 }
  0x2a   : > { %p1372_p2 = pnand %p1371_p8, %p1365_p6 }
  0x2c   : > { %1375 = shalt.err (!%p1372_p2)
}
  0x2d   : > { %1250 = dma.hbm_to_vmem [thread:$0]  (!%p1706_p11), %s2073_s1, 128, %s244_s11, [#allocation6]  }
  0x2e   : > { %s1376_s27 = scalar_lea.hbm %s2074_s2, 128 }
  0x2f   : > { %p1377_p9 = scmp.ne.s32.totalorder %s2074_s2, %s1376_s27  ;;  %p1383_p2 = scmp.lt.u32.totalorder %s1376_s27, %s2074_s2 }
  0x31   : > { %p1379_p12 = pnand %p1377_p9, %p1722_p13 }
  0x33   : > { %p1380_p1 = pneg %p1379_p12 }
  0x35   : > { %p1385_p4 = pnand %p1383_p2, %p1380_p1 }
  0x37   : > { %1388 = shalt.err (!%p1385_p4)
}
  0x38   : > { %s1389_s11 = scalar_lea.vmem %s1710_s13, 128  ;;  %p1397_p3 = scmp.lt.s32.totalorder %s1710_s13, %s1710_s13 }
  0x39   : > { %p1390_p6 = scmp.ne.s32.totalorder %s1710_s13, %s1389_s11  ;;  %p1398_p5 = scmp.lt.s32.totalorder %s1389_s11, %s1389_s11 }
  0x3b   : > { %p1392_p8 = pnand %p1390_p6, %p1722_p13  ;;  %p1399_p7 = por %p1398_p5, %p1397_p3 }
  0x3d   : > { %p1393_p0 = pneg %p1392_p8 }
  0x3f   : > { %p1400_p10 = pnand %p1399_p7, %p1393_p0 }
  0x41   : > { %1403 = shalt.err (!%p1400_p10)
}
  0x42   : > { %1253 = dma.hbm_to_vmem [thread:$0]  (!%p1706_p11), %s2074_s2, 128, %s1710_s13, [#allocation6]  }
  0x43   : > { %s1404_s20 = scalar_lea.hbm %s2076_s4, 256 }
  0x44   : > { %p1405_p9 = scmp.ne.s32.totalorder %s2076_s4, %s1404_s20  ;;  %p1411_p2 = scmp.lt.u32.totalorder %s1404_s20, %s2076_s4 }
  0x46   : > { %p1407_p12 = pnand %p1405_p9, %p1722_p13 }
  0x48   : > { %p1408_p1 = pneg %p1407_p12 }
  0x4a   : > { %p1413_p4 = pnand %p1411_p2, %p1408_p1 }
  0x4c   : > { %1416 = shalt.err (!%p1413_p4)
}
  0x4d   : > { %s1417_s13 = scalar_lea.vmem %s1712_s16, 256  ;;  %p1425_p3 = scmp.lt.s32.totalorder %s1712_s16, %s1712_s16 }
  0x4e   : > { %p1418_p6 = scmp.ne.s32.totalorder %s1712_s16, %s1417_s13  ;;  %p1426_p5 = scmp.lt.s32.totalorder %s1417_s13, %s1417_s13 }
  0x50   : > { %p1420_p8 = pnand %p1418_p6, %p1722_p13  ;;  %p1427_p7 = por %p1426_p5, %p1425_p3 }
  0x52   : > { %p1421_p0 = pneg %p1420_p8 }
  0x54   : > { %p1428_p10 = pnand %p1427_p7, %p1421_p0 }
  0x56   : > { %1431 = shalt.err (!%p1428_p10)
}
  0x57   : > { %s1589_s11 = smov 64   ;;  %s1590_s28 = smov 4  }
  0x58   : > { %1256 = dma.hbm_to_vmem [thread:$0]  (!%p1706_p11), %s2076_s4, 256, %s1712_s16, [#allocation9], %s1589_s11, %s1589_s11, %s1590_s28  }
  0x59   : > { %s49_s18 = sadd.s32 1, %s1572_s23  ;;  %s40_s19 = sadd.s32 1, %s1580_s25 }
  0x5a   : > { %p56_p13 = scmp.ne.s32.totalorder %s1572_s23, %s1568_s22  ;;  %p42_p9 = scmp.ge.s32.totalorder %s40_s19, 2 }
  0x5b   : > { %p57_p12 = scmp.eq.s32.totalorder %s1584_s26, 0  ;;  %p2092_p1 = scmp.ne.s32.totalorder %s2085_s30, 0 }
  0x5c   : > { %p1271_p4 = scmp.lt.s32.totalorder %s1584_s26, 2  ;;  %s2107_s19 = smov (%p42_p9, %s40_s19), 0 }
  0x5d   : > { %p1791_p2 = por %p2092_p1, %p56_p13  ;;  %p58_p6 = por %p57_p12, %p56_p13 }
  0x5e   : > { %s287_s14 = sand.u32 1, %s1572_s23   ;;  %s44_s27 = ssub.s32 %s1580_s25, %s2107_s19 }
  0x5f   : > { %p47_p8 = scmp.eq.s32.totalorder %s44_s27, 0  ;;  %s1198_s16 = sshll.u32 %s287_s14, 3 }
  0x60   : > { %s1199_s10 = sshll.u32 %s1580_s25, 7  ;;  %s291_s11 = scalar_lea.vmem [#allocation2], %s1198_s16 }
  0x61   : > { %s1803_s12 = scalar_select %p47_p8, %s1572_s23, %s49_s18  }
  0x62   : > { %s1808_s30 = scalar_lea.hbm %s2072_s0, %s1199_s10  ;;  %s299_s28 = sshll.u32 %s291_s11, 4  ;;  %s1810_s28 = int_to_ptr.vmem [resolvable:$true] %s299_s28 }
  0x63   : > { %p1814_p11 = pnand %p1271_p4, %p58_p6  ;;  %s288_s17 = scalar_lea.sflag [#allocation3], %s287_s14 }
  0x64   : > { %s1432_s18 = scalar_lea.hbm %s1808_s30, 128  ;;  %s1437_s10 = scalar_lea.hbm %s2072_s0, 256 }
  0x65   : > { %p1433_p0 = scmp.ne.s32.totalorder %s1808_s30, %s1432_s18  ;;  %p1434_p3 = pneg %p1814_p11 }
  0x66   : > { %p1438_p10 = scmp.lt.u32.totalorder %s1808_s30, %s2072_s0  ;;  %p1439_p13 = scmp.lt.u32.totalorder %s1437_s10, %s1432_s18 }
  0x67   : > { %p1435_p5 = pnand %p1434_p3, %p1433_p0  ;;  %p1441_p12 = scmp.lt.u32.totalorder %s1432_s18, %s1808_s30 }
  0x68   : > { %p1440_p9 = por %p1439_p13, %p1438_p10 }
  0x69   : > { %p1436_p7 = pneg %p1435_p5 }
  0x6a   : > { %p1442_p1 = por %p1441_p12, %p1440_p9 }
  0x6c   : > { %p1443_p4 = pnand %p1442_p1, %p1436_p7 }
  0x6e   : > { %1446 = shalt.err (!%p1443_p4)
}
  0x6f   : > { %s1447_s14 = scalar_lea.vmem %s1810_s28, 128  ;;  %s1591_s11 = smov [#allocation2]  }
  0x70   : > { %p1448_p6 = scmp.ne.s32.totalorder %s1810_s28, %s1447_s14  ;;  %s1452_s27 = sshll.u32 %s1591_s11, 4  ;;  %s1453_s27 = int_to_ptr.vmem [resolvable:$false] %s1452_s27 }
  0x71   : > { %s1454_s16 = scalar_lea.vmem %s1453_s27, 256  ;;  %p1455_p5 = scmp.lt.s32.totalorder %s1810_s28, %s1453_s27 }
  0x72   : > { %p1450_p8 = pnand %p1448_p6, %p1434_p3  ;;  %p1456_p10 = scmp.lt.s32.totalorder %s1454_s16, %s1447_s14 }
  0x74   : > { %p1451_p0 = pneg %p1450_p8  ;;  %p1457_p13 = por %p1456_p10, %p1455_p5 }
  0x76   : > { %p1458_p9 = pnand %p1457_p13, %p1451_p0 }
  0x78   : > { %1461 = shalt.err (!%p1458_p9)
}
  0x79   : > { %1260 = dma.hbm_to_vmem [thread:$0]  (!%p1814_p11), %s1808_s30, 128, %s1810_s28, %s288_s17  }
  0x7a   : > { %p2095_p7 = scmp.ne.s32.totalorder %s2089_s9, 0 }
  0x7b   : > { %s1846_s18 = sand.u32 (!%p2095_p7), 1, %s1568_s22   ;;  %p2096_p3 = scmp.ne.s32.totalorder (!%p2095_p7), %s2086_s7, 0 }
  0x7c   : > { %308 = sbr.rel (%p2095_p7) target bundleno = 748 (0x2ec), region = 40  ;;  %s1201_s10 = sshll.u32 (!%p2095_p7), %s1846_s18, 3 }
  0x7d   : > { %s311_s15 = scalar_lea.sflag (!%p2095_p7), [#allocation3], %s1846_s18  ;;  %s314_s13 = scalar_lea.vmem (!%p2095_p7), [#allocation2], %s1201_s10 }
  0x83   : > { %1543 = dma.done.wait (%p2096_p3), %s311_s15, 128  }
  0x84   : > { %1545 = vsyncadd (%p2096_p3), %s311_s15, 4294967168  ;;  %p2097_p12 = scmp.ne.s32.totalorder %s2084_s29, 0 }
  0x86   : > { %1547 = dma.done.wait (%p2097_p12), [#allocation6], 256  }
  0x87   : > { %1549 = vsyncadd (%p2097_p12), [#allocation6], 4294967040 }
  0x88   : > { %1551 = dma.done.wait (%p2097_p12), [#allocation9], 256  }
  0x89   : > { %1553 = vsyncadd (%p2097_p12), [#allocation9], 4294967040  ;;  %v437_v0 = vlaneseq  ;;  %v1592_v1 = vmov 0.0   ;;  %vm1593_vm0 = vmmov 0   ;;  %v1594_v2 = vmov 1966171168  }
  0x8a   : > { %1221 = vmatprep.subr.bf16.mxu0 %v1592_v1  ;;  %1225 = vmatprep.mubr.msk.bf16.mxu0 %vm1593_vm0, %v1592_v1  ;;  %v435_v3 = vunpack.c.l.s4 %v1594_v2  ;;  %v1343_v7 = vld [vmem:[#allocation8] sm:$0xff]   ;;  %v1344_v8 = vld [vmem:[#allocation8 + $0x8] sm:$0xff]   ;;  %v1595_v10 = vmov 1983009808   ;;  %v608_v12 = vld [vmem:[#allocation7] sm:$0xff]  ;;  %vm387_vm1 = vcmask 261120  }
  0x8b   : > { %v438_v4 = vshrl.u32 %v437_v0, 7  ;;  %1222 = vmatpush3.bf16.msra.mxu0 %v1343_v7  ;;  %v369_v9 = vld [vmem:[%s314_s13] sm:$0xff]  ;;  %v524_v11 = vunpack.c.l.s4 %v1595_v10  ;;  %v610_v13 = vcombine.high %v608_v12, %v608_v12  ;;  %v1596_v21 = vmov 1934713408   ;;  %s1597_s29 = smov 8   ;;  %s1598_s7 = smov 24  }
  0x8c   : > { %v436_v5 = vunpack.c.0.s8 %v435_v3  ;;  %1223 = vmatprep.subr.bf16.mxu0 %v1592_v1  ;;  %v370_v16 = vpack.c.bf16 %v369_v9, %v369_v9  ;;  %v557_v22 = vunpack.c.l.s4 %v1596_v21  ;;  %s1599_s9 = smov 16   ;;  %v782_v62 = vld [vmem:[%s2075_s3] sm:$0xff]  ;;  %vm602_vm2 = vcmask 64512   ;;  %s1600_s8 = smov 1  }
  0x8d   : > { %v1865_v15 = vsub.s32 0, %v438_v4  ;;  %v525_v20 = vunpack.c.0.s8 %v524_v11  ;;  %v784_v63 = vcombine.high %v782_v62, %v782_v62  ;;  %vm604_vm3 = vcmask 130048   ;;  %s1601_s17 = smov 32   ;;  %s1602_s14 = smov 31  }
  0x8e   : > { %v1862_v6 = vsub.s32 %v436_v5, %v438_v4  ;;  %v558_v33 = vunpack.c.0.s8 %v557_v22  ;;  %vm606_vm4 = vcmask 195584   ;;  %vm956_vm5 = vcmask 1047808   ;;  %s1603_s11 = smov 127   ;;  %s1604_s27 = smov 97  }
  0x8f   : > { %1224 = vmatpush3.bf16.msra.mxu0 %v1344_v8  ;;  %v1874_v32 = vsub.s32 %v525_v20, %v438_v4  ;;  %s1605_s16 = smov 96   ;;  %s1205_s10 = sshll.u32 %s1846_s18, 2  ;;  %vm985_vm6 = vcmask 257024  }
  0x90   : > { %v617_v14 = vrot.slane %v608_v12, %v1862_v6  ;;  %v624_v17 = vrot.slane %v610_v13, %v1862_v6  ;;  %v1883_v45 = vsub.s32 %v558_v33, %v438_v4  ;;  %v791_v0 = vrot.slane %v782_v62, %v1862_v6  ;;  %s1213_s15 = sshll.u32 %s1576_s24, 6  ;;  %s363_s13 = scalar_lea.vmem [#allocation11], %s1205_s10 }
  0x91   : > { %v798_v1 = vrot.slane %v784_v63, %v1862_v6  ;;  %s1984_s30 = scalar_lea.hbm %s2078_s6, %s1213_s15  ;;  %s1988_s28 = scalar_lea.vmem [#allocation10], %s1205_s10 }
  0x92   : > { %v625_v18 = vcombine.high %v617_v14, %v617_v14  ;;  %v633_v19 = vrot.slane %v617_v14, %v1862_v6  ;;  %v626_v23 = vcombine.high %v624_v17, %v624_v17  ;;  %v640_v24 = vrot.slane %v624_v17, %v1862_v6  ;;  %1226 = vmatmul.mubr.msk.bf16.vlgmr.msra.gmra.mrb[0].mxu0 %vm387_vm1, %v370_v16 }
  0x93   : > { %v799_v2 = vcombine.high %v791_v0, %v791_v0  ;;  %v800_v3 = vcombine.high %v798_v1, %v798_v1  ;;  %v807_v4 = vrot.slane %v791_v0, %v1862_v6  ;;  %v814_v5 = vrot.slane %v798_v1, %v1862_v6 }
  0x94   : > { %v647_v25 = vrot.slane %v625_v18, %v1862_v6  ;;  %v655_v26 = vcombine.high %v633_v19, %v633_v19  ;;  %v662_v27 = vrot.slane %v633_v19, %v1865_v15  ;;  %v654_v28 = vrot.slane %v626_v23, %v1862_v6 }
  0x95   : > { %v656_v29 = vcombine.high %v640_v24, %v640_v24  ;;  %v678_v35 = vrot.slane %v640_v24, %v1865_v15  ;;  %v821_v7 = vrot.slane %v799_v2, %v1862_v6  ;;  %v828_v8 = vrot.slane %v800_v3, %v1862_v6 }
  0x96   : > { %v657_v30 = vcombine.high %v647_v25, %v647_v25  ;;  %v666_v31 = vrot.slane %v647_v25, %v1865_v15  ;;  %v670_v34 = vrot.slane %v655_v26, %v1865_v15  ;;  %v658_v36 = vcombine.high %v654_v28, %v654_v28 }
  0x97   : > { %v682_v38 = vrot.slane %v654_v28, %v1865_v15  ;;  %v686_v39 = vrot.slane %v656_v29, %v1865_v15  ;;  %v829_v9 = vcombine.high %v807_v4, %v807_v4  ;;  %v830_v10 = vcombine.high %v814_v5, %v814_v5 }
  0x98   : > { %v674_v37 = vrot.slane %v657_v30, %v1865_v15  ;;  %v699_v40 = vcombine.low %v662_v27, %v670_v34  ;;  %v690_v41 = vrot.slane %v658_v36, %v1865_v15  ;;  %v831_v11 = vcombine.high %v821_v7, %v821_v7 }
  0x99   : > { %v715_v43 = vcombine.low %v678_v35, %v686_v39  ;;  %v832_v12 = vcombine.high %v828_v8, %v828_v8  ;;  %v836_v13 = vrot.slane %v807_v4, %v1865_v15  ;;  %v840_v14 = vrot.slane %v821_v7, %v1865_v15 }
  0x9a   : > { %v707_v42 = vcombine.low %v666_v31, %v674_v37  ;;  %v706_v44 = vrot.slane %v699_v40, %v1874_v32  ;;  %v723_v48 = vcombine.low %v682_v38, %v690_v41  ;;  %v844_v16 = vrot.slane %v829_v9, %v1865_v15 }
  0x9b   : > { %v722_v47 = vrot.slane %v715_v43, %v1874_v32  ;;  %v848_v17 = vrot.slane %v831_v11, %v1865_v15  ;;  %v852_v18 = vrot.slane %v814_v5, %v1865_v15  ;;  %v856_v19 = vrot.slane %v828_v8, %v1865_v15 }
  0x9c   : > { %v714_v46 = vrot.slane %v707_v42, %v1874_v32  ;;  %v730_v49 = vrot.slane %v723_v48, %v1874_v32  ;;  %v860_v20 = vrot.slane %v830_v10, %v1865_v15  ;;  %v864_v21 = vrot.slane %v832_v12, %v1865_v15 }
  0x9d   : > { %v873_v22 = vcombine.low %v836_v13, %v844_v16  ;;  %v881_v23 = vcombine.low %v840_v14, %v848_v17 }
  0x9e   : > { %v731_v50 = vcombine.low %v706_v44, %v714_v46  ;;  %v732_v51 = vcombine.high %v706_v44, %v714_v46  ;;  %v747_v53 = vcombine.low %v722_v47, %v730_v49  ;;  %v748_v55 = vcombine.high %v722_v47, %v730_v49  ;;  %v431_v49 = vld [vmem:[#allocation5] sm:$0xff] }
  0x9f   : > { %v889_v24 = vcombine.low %v852_v18, %v860_v20  ;;  %v897_v25 = vcombine.low %v856_v19, %v864_v21  ;;  %v880_v26 = vrot.slane %v873_v22, %v1874_v32  ;;  %v888_v27 = vrot.slane %v881_v23, %v1874_v32 }
  0xa0   : > { %v1889_v52 = vrot.slane %v731_v50, %v1883_v45  ;;  %v746_v54 = vrot.slane %v732_v51, %v1883_v45  ;;  %v755_v56 = vrot.slane %v747_v53, %v1883_v45  ;;  %v762_v57 = vrot.slane %v748_v55, %v1883_v45 }
  0xa1   : > { %v896_v28 = vrot.slane %v889_v24, %v1874_v32  ;;  %v904_v29 = vrot.slane %v897_v25, %v1874_v32  ;;  %v905_v30 = vcombine.low %v880_v26, %v888_v27  ;;  %v906_v35 = vcombine.high %v880_v26, %v888_v27 }
  0xa2   : > { %v764_v58 = vcombine.high %v1889_v52, %v755_v56  ;;  %v763_v59 = vcombine.low %v1889_v52, %v755_v56  ;;  %v766_v60 = vcombine.high %v746_v54, %v762_v57  ;;  %v765_v61 = vcombine.low %v746_v54, %v762_v57 }
  0xa3   : > { %v921_v31 = vcombine.low %v896_v28, %v904_v29  ;;  %v1921_v33 = vrot.slane %v905_v30, %v1883_v45  ;;  %v922_v36 = vcombine.high %v896_v28, %v904_v29  ;;  %v1929_v38 = vrot.slane %v906_v35, %v1883_v45 }
  0xa4   : > { %768 = vrot.lane.b32.xlu0 %v764_v58, %s1597_s29  ;;  %776 = vrot.lane.b32.xlu1 %v766_v60, %s1598_s7  ;;  %v433_v50 = vcombine.high %v431_v49, %v431_v49  ;;  %v440_v51 = vrot.slane %v431_v49, %v1862_v6 }
  0xa5   : > { %v1924_v34 = vrot.slane %v921_v31, %v1883_v45  ;;  %v1932_v39 = vrot.slane %v922_v36, %v1883_v45 }
  0xa6   : > { %v447_v52 = vrot.slane %v433_v50, %v1862_v6  ;;  %v448_v53 = vcombine.high %v440_v51, %v440_v51  ;;  %v456_v55 = vrot.slane %v440_v51, %v1862_v6 }
  0xa7   : > { %v938_v37 = vcombine.high %v1921_v33, %v1924_v34  ;;  %v939_v40 = vcombine.low %v1929_v38, %v1932_v39  ;;  %v940_v41 = vcombine.high %v1929_v38, %v1932_v39 }
  0xa8   : > { %772 = vrot.lane.b32.xlu0 %v765_v61, %s1599_s9  ;;  %v449_v54 = vcombine.high %v447_v52, %v447_v52  ;;  %v463_v56 = vrot.slane %v447_v52, %v1862_v6  ;;  %v470_v57 = vrot.slane %v448_v53, %v1862_v6  ;;  %v485_v63 = vrot.slane %v456_v55, %v1865_v15 }
  0xaa   : > { %v477_v58 = vrot.slane %v449_v54, %v1862_v6  ;;  %v479_v60 = vcombine.high %v463_v56, %v463_v56  ;;  %v480_v61 = vcombine.high %v470_v57, %v470_v57  ;;  %v489_v0 = vrot.slane %v470_v57, %v1865_v15 }
  0xab   : > { %v501_v3 = vrot.slane %v463_v56, %v1865_v15 }
  0xac   : > { %942 = vrot.lane.b32.xlu0 %v938_v37, %s1597_s29  ;;  %v481_v62 = vcombine.high %v477_v58, %v477_v58  ;;  %v497_v2 = vrot.slane %v480_v61, %v1865_v15  ;;  %v505_v4 = vrot.slane %v477_v58, %v1865_v15  ;;  %v509_v5 = vrot.slane %v479_v60, %v1865_v15 }
  0xae   : > { %v513_v6 = vrot.slane %v481_v62, %v1865_v15  ;;  %v530_v8 = vcombine.low %v489_v0, %v497_v2  ;;  %v538_v9 = vcombine.low %v501_v3, %v509_v5 }
  0xb0   : > { %950 = vrot.lane.b32.xlu0 %v940_v41, %s1598_s7  ;;  %v546_v10 = vcombine.low %v505_v4, %v513_v6  ;;  %v537_v12 = vrot.slane %v530_v8, %v1874_v32  ;;  %v545_v13 = vrot.slane %v538_v9, %v1874_v32 }
  0xb2   : > { %v553_v14 = vrot.slane %v546_v10, %v1874_v32 }
  0xb4   : > { %v570_v17 = vcombine.low %v545_v13, %v553_v14 }
  0xb6   : > { %v578_v19 = vrot.slane %v570_v17, %v1883_v45 }
 0x116   : > { %v769_v42 = vpop.permute.xlu0 %768  ;;  %v777_v44 = vpop.permute.xlu1 %776 }
 0x117   : > { %v779_v43 = vsel %vm602_vm2, %v763_v59, %v769_v42  ;;  %v478_v59 = vcombine.high %v456_v55, %v456_v55 }
 0x119   : > { %v493_v1 = vrot.slane %v478_v59, %v1865_v15  ;;  %v571_v15 = vcombine.high %v545_v13, %v553_v14 }
 0x11a   : > { %v773_v46 = vpop.permute.xlu0 %772 }
 0x11b   : > { %v780_v47 = vsel %vm604_vm3, %v779_v43, %v773_v46  ;;  %v522_v7 = vcombine.low %v485_v63, %v493_v1  ;;  %v585_v23 = vrot.slane %v571_v15, %v1883_v45 }
 0x11c   : > { %v781_v48 = vsel %vm606_vm4, %v780_v47, %v777_v44 }
 0x11d   : > { %965 = vrot.lane.b32.xlu0 %v781_v48, %s1600_s8  ;;  %v529_v11 = vrot.slane %v522_v7, %v1874_v32  ;;  %s1015_s8 = sshll.u32 %s1988_s28, 4  ;;  %s2023_s8 = int_to_ptr.vmem [resolvable:$true] %s1015_s8 }
 0x11e   : > { %v943_v29 = vpop.permute.xlu0 %942 }
 0x11f   : > { %v554_v16 = vcombine.low %v529_v11, %v537_v12  ;;  %v555_v20 = vcombine.high %v529_v11, %v537_v12 }
 0x121   : > { %v562_v18 = vrot.slane %v554_v16, %v1883_v45  ;;  %v569_v22 = vrot.slane %v555_v20, %v1883_v45  ;;  %v937_v45 = vcombine.low %v1921_v33, %v1924_v34 }
 0x122   : > { %v951_v35 = vpop.permute.xlu0 %950 }
 0x123   : > { %v587_v21 = vcombine.high %v562_v18, %v578_v19  ;;  %v588_v24 = vcombine.low %v569_v22, %v585_v23  ;;  %v589_v25 = vcombine.high %v569_v22, %v585_v23  ;;  %v953_v36 = vsel %vm602_vm2, %v937_v45, %v943_v29 }
 0x124   : > { %v586_v46 = vcombine.low %v562_v18, %v578_v19 }
 0x125   : > { %591 = vrot.lane.b32.xlu0 %v587_v21, %s1597_s29  ;;  %s1029_s29 = sshll.u32 %s363_s13, 4  ;;  %s1986_s29 = int_to_ptr.vmem [resolvable:$true] %s1029_s29 }
 0x129   : > { %599 = vrot.lane.b32.xlu0 %v589_v25, %s1598_s7 }
 0x165   : > { %v425_v26 = vpop.f32.mrb[0].mxu0 }
 0x166   : > { %957 = vrot.lane.b32.xlu1 %v425_v26, %s1601_s17  ;;  %v1227_v32 = vpop.f32.mrb[1].mxu0  ;;  %v1217_v44 = vpack.c.bf16 %v425_v26, %v425_v26 }
 0x167   : > { %v428_v27 = vpop.f32.mrb[2].mxu0 }
 0x168   : > { %v1228_v28 = vpop.f32.mrb[3].mxu0 }
 0x16a   : > { %946 = vrot.lane.b32.xlu1 %v939_v40, %s1599_s9 }
 0x18f   : > { %v966_v41 = vpop.permute.xlu0 %965 }
 0x197   : > { %v592_v47 = vpop.permute.xlu0 %591 }
 0x198   : > { %v603_v48 = vsel %vm602_vm2, %v586_v46, %v592_v47 }
 0x19b   : > { %v600_v51 = vpop.permute.xlu0 %599 }
 0x1d8   : > { %v958_v30 = vpop.permute.xlu1 %957 }
 0x1d9   : > { %v959_v31 = vsel %vm956_vm5, %v958_v30, %v425_v26 }
 0x1da   : > { %960 = vrot.lane.b32.xlu1 %v959_v31, %s1601_s17  ;;  %s1001_s17 = scalar_lea.sflag [#allocation12], %s1846_s18 }
 0x1dc   : > { %v947_v37 = vpop.permute.xlu1 %946 }
 0x1dd   : > { %v954_v38 = vsel %vm604_vm3, %v953_v36, %v947_v37 }
 0x1de   : > { %v955_v39 = vsel %vm606_vm4, %v954_v38, %v951_v35 }
 0x1df   : > { %975 = vrot.lane.b32.xlu1 %v955_v39, %s1602_s14  ;;  %s1462_s14 = scalar_lea.vmem %s1986_s29, 64 }
 0x1e0   : > { %p1463_p11 = scmp.ne.s32.totalorder %s1986_s29, %s1462_s14 }
 0x1e2   : > { %p1464_p1 = pnand %p1463_p11, %p1791_p2 }
 0x1e3   : > { %595 = vrot.lane.b32.xlu1 %v588_v24, %s1599_s9 }
 0x1e4   : > { %p1465_p4 = pneg %p1464_p1 }
 0x24c   : > { %v961_v40 = vpop.permute.xlu1 %960 }
 0x24d   : > { %v962_v42 = vsel %vm956_vm5, %v961_v40, %v425_v26 }
 0x24e   : > { %v968_v43 = vmul.f32 %v966_v41, %v962_v42 }
 0x250   : > { %970 = vrot.lane.b32.xlu1 %v968_v43, %s1603_s11  ;;  %s1606_s11 = smov [#allocation11]  }
 0x251   : > { %v976_v33 = vpop.permute.xlu1 %975 }
 0x252   : > { %v978_v34 = vmul.f32 %v976_v33, %v962_v42 }
 0x254   : > { %980 = vrot.lane.b32.xlu0 %v978_v34, %s1604_s27  ;;  %991 = vrot.lane.b32.xlu1 %v1217_v44, %s1605_s16  ;;  %s1466_s27 = sshll.u32 %s1606_s11, 4  ;;  %s1467_s27 = int_to_ptr.vmem [resolvable:$false] %s1466_s27 }
 0x255   : > { %v596_v49 = vpop.permute.xlu1 %595  ;;  %s1468_s16 = scalar_lea.vmem %s1467_s27, 128  ;;  %p1469_p6 = scmp.lt.s32.totalorder %s1986_s29, %s1467_s27 }
 0x256   : > { %v605_v50 = vsel %vm604_vm3, %v603_v48, %v596_v49  ;;  %p1470_p8 = scmp.lt.s32.totalorder %s1468_s16, %s1462_s14 }
 0x257   : > { %v607_v52 = vsel %vm606_vm4, %v605_v50, %v600_v51 }
 0x258   : > { %v963_v54 = vmul.f32 %v607_v52, %v425_v26  ;;  %p1471_p0 = por %p1470_p8, %p1469_p6 }
 0x25a   : > { %p1472_p5 = pnand %p1471_p0, %p1465_p4 }
 0x2c2   : > { %v971_v53 = vpop.permute.xlu1 %970 }
 0x2c3   : > { %v973_v55 = vadd.f32 %v971_v53, %v963_v54 }
 0x2c6   : > { %v981_v56 = vpop.permute.xlu0 %980  ;;  %v992_v57 = vpop.permute.xlu1 %991 }
 0x2c7   : > { %v983_v58 = vadd.f32 %v981_v56, %v973_v55  ;;  %994 = vst.msk [vmem:[%s363_s13] sm:$0xf] %vm985_vm6, %v992_v57 }
 0x2c8   : > { %1475 = shalt.err (!%p1472_p5)
}
 0x2c9   : > { %s1476_s10 = scalar_lea.hbm %s1984_s30, 64  ;;  %s1480_s9 = scalar_lea.hbm %s2078_s6, 128 }
 0x2ca   : > { %p1477_p10 = scmp.ne.s32.totalorder %s1984_s30, %s1476_s10  ;;  %p1481_p7 = scmp.lt.u32.totalorder %s1984_s30, %s2078_s6 }
 0x2cb   : > { %p1482_p3 = scmp.lt.u32.totalorder %s1480_s9, %s1476_s10  ;;  %p1484_p11 = scmp.lt.u32.totalorder %s1476_s10, %s1984_s30 }
 0x2cc   : > { %p1478_p13 = pnand %p1477_p10, %p1791_p2 }
 0x2cd   : > { %p1483_p12 = por %p1482_p3, %p1481_p7 }
 0x2ce   : > { %p1479_p9 = pneg %p1478_p13 }
 0x2cf   : > { %p1485_p1 = por %p1484_p11, %p1483_p12 }
 0x2d1   : > { %p1486_p4 = pnand %p1485_p1, %p1479_p9 }
 0x2d3   : > { %1489 = shalt.err (!%p1486_p4)
}
 0x2d4   : > { %1244 = dma.vmem_to_hbm [thread:$0]  (%p1791_p2), %s1986_s29, 64, %s1984_s30, %s1001_s17   ;;  %v984_v59 = vpack.c.bf16 %v983_v58, %v983_v58 }
 0x2d5   : > { %s2019_s13 = scalar_lea.hbm %s2077_s5, %s1213_s15  ;;  %s996_s10 = scalar_lea.sflag [#allocation4], %s1846_s18 }
 0x2d6   : > { %986 = vst.msk [vmem:[%s1988_s28] sm:$0xf] %vm985_vm6, %v984_v59  ;;  %s1490_s7 = scalar_lea.vmem %s2023_s8, 64  ;;  %s1607_s24 = smov [#allocation10]  }
 0x2d7   : > { %p1491_p6 = scmp.ne.s32.totalorder %s2023_s8, %s1490_s7  ;;  %s1494_s29 = sshll.u32 %s1607_s24, 4  ;;  %s1495_s29 = int_to_ptr.vmem [resolvable:$false] %s1494_s29 }
 0x2d8   : > { %s1496_s30 = scalar_lea.vmem %s1495_s29, 128  ;;  %p1497_p5 = scmp.lt.s32.totalorder %s2023_s8, %s1495_s29 }
 0x2d9   : > { %p1492_p8 = pnand %p1491_p6, %p1791_p2  ;;  %p1498_p10 = scmp.lt.s32.totalorder %s1496_s30, %s1490_s7 }
 0x2db   : > { %p1493_p0 = pneg %p1492_p8  ;;  %p1499_p13 = por %p1498_p10, %p1497_p5 }
 0x2dd   : > { %p1500_p9 = pnand %p1499_p13, %p1493_p0 }
 0x2df   : > { %1503 = shalt.err (!%p1500_p9)
}
 0x2e0   : > { %s1504_s18 = scalar_lea.hbm %s2019_s13, 64  ;;  %s1508_s17 = scalar_lea.hbm %s2077_s5, 128 }
 0x2e1   : > { %p1505_p7 = scmp.ne.s32.totalorder %s2019_s13, %s1504_s18  ;;  %p1509_p11 = scmp.lt.u32.totalorder %s2019_s13, %s2077_s5 }
 0x2e2   : > { %p1510_p1 = scmp.lt.u32.totalorder %s1508_s17, %s1504_s18  ;;  %p1512_p6 = scmp.lt.u32.totalorder %s1504_s18, %s2019_s13 }
 0x2e3   : > { %p1506_p3 = pnand %p1505_p7, %p1791_p2 }
 0x2e4   : > { %p1511_p4 = por %p1510_p1, %p1509_p11 }
 0x2e5   : > { %p1507_p12 = pneg %p1506_p3 }
 0x2e6   : > { %p1513_p8 = por %p1512_p6, %p1511_p4 }
 0x2e8   : > { %p1514_p0 = pnand %p1513_p8, %p1507_p12 }
 0x2ea   : > { %1517 = shalt.err (!%p1514_p0)
}
 0x2eb   : > { %1243 = dma.vmem_to_hbm [thread:$0]  (%p1791_p2), %s2023_s8, 64, %s2019_s13, %s996_s10  }
 0x2ec PF: > { %s2098_s27 = sld [smem:[#allocation18_spill]]  ;;  %s1041_s14 = sand.u32 1, %s1564_s21  }
 0x2ed   : > { %p2100_p10 = scmp.ge.s32.totalorder %s1584_s26, 2  ;;  %s1042_s16 = scalar_lea.sflag [#allocation4], %s1041_s14 }
 0x2f2   : > { %p2099_p5 = scmp.ne.s32.totalorder %s2098_s27, 0 }
 0x2f4   : > { %p1262_p13 = pnand %p2100_p10, %p2099_p5 }
 0x2f6   : > { %1555 = dma.done.wait (!%p1262_p13), %s1042_s16, 64  }
 0x2f7   : > { %1557 = vsyncadd (!%p1262_p13), %s1042_s16, 4294967232  ;;  %s1051_s7 = scalar_lea.sflag [#allocation12], %s1041_s14 }
 0x2f8   : > { %1559 = dma.done.wait (!%p1262_p13), %s1051_s7, 64  }
 0x2f9   : > { %1561 = vsyncadd (!%p1262_p13), %s1051_s7, 4294967232  ;;  %s28_s26 = sadd.s32 1, %s1584_s26   ;;  %s2101_s21 = smov %s1568_s22 }
 0x2fa   : > { %p25_p9 = scmp.ge.s32.totalorder %s28_s26, 4   ;;  %s2102_s22 = smov %s1572_s23 }
 0x2fb   : > { %s2103_s23 = smov %s1803_s12  ;;  %s2104_s24 = smov %s1580_s25 }
 0x2fc   : > { %s2105_s25 = smov %s2107_s19  ;;  %27 = sbr.rel (!%p25_p9) target bundleno = 10 (0xa), region = 119 }
 0x303   :  { %1056 = vsyncpa [#allocation3], 1 }
 0x304   :  { %1058 = vsyncpa [#allocation3 + $0x1], 1 }
 0x305   :  { %1059 = vsyncpa [#allocation6], 1 }
 0x306   :  { %1060 = vsyncpa [#allocation9], 1 }
 0x307   :  { %1061 = vsyncpa [#allocation4], 1 }
 0x308   :  { %1063 = vsyncpa [#allocation4 + $0x1], 1 }
 0x309   :  { %1064 = vsyncpa [#allocation12], 1 }
 0x30a   :  { %1066 = vsyncpa [#allocation12 + $0x1], 1 }

</bundles_post_ra>
